<compile_context>
chip_gen: v7x
topology: tpu7x:2x2x1
jax: 0.10.0
libtpu: 0.0.40
codegen_flags: <defaults>
</compile_context>

<pallas_src>
import functools

import jax
import jax.numpy as jnp
import numpy as np
from jax.experimental import pallas as pl
from jax.experimental.pallas import tpu as pltpu


# ----------------------------------------------------------------------------
# Fused kernel.
#   x_ref    : (B, H, W)        bf16 input (single channel, lanes = x)
#   w1_ref   : (3, W, W*C)      bf16 layer-1 block-Toeplitz weights (Cin=1)
#   w23_ref  : (2, 3, W*C, W*C) bf16 layer-2/3 block-Toeplitz weights
#   bconv_ref: (3, W*C)         f32 conv biases, tiled across x
#   wfc_ref  : (W*C, 128)       f32 pool-gather @ fc weight, N padded to 128
#   bfc_ref  : (1, 128)         f32 fc bias, padded to 128
#   o_ref    : (B, 128)         f32 logits (sliced to 10 in the wrapper)
#   slab0_ref: (B, H+2, W)      bf16 scratch: layer-1 input with zero y-halo
#   slab_ref : (B, H+2, W*C)    bf16 scratch: lane-dense activations, zero y-halo
# ----------------------------------------------------------------------------
def _small_cnn_kernel(x_ref, w1_ref, w23_ref, bconv_ref, wfc_ref, bfc_ref,
                      o_ref, slab0_ref, slab_ref):
    B, Hp, WC = slab_ref.shape
    H = Hp - 2
    W = slab0_ref.shape[2]
    inv_hw = 1.0 / float(H * W)

    # Zero only the y-halo rows.  "same" x-padding is folded into the
    # block-Toeplitz weights, so there is no x halo and interior stores are
    # full-lane-width (no vst.msk).
    slab0_ref[:, 0:1, :] = jnp.zeros((B, 1, W), slab0_ref.dtype)
    slab0_ref[:, Hp - 1:Hp, :] = jnp.zeros((B, 1, W), slab0_ref.dtype)
    slab_ref[:, 0:1, :] = jnp.zeros((B, 1, WC), slab_ref.dtype)
    slab_ref[:, Hp - 1:Hp, :] = jnp.zeros((B, 1, WC), slab_ref.dtype)

    # Layer-1 input: single channel written once into the interior rows.
    slab0_ref[:, 1:Hp - 1, :] = x_ref[...]

    def conv3x3_relu(src_ref, wdy, bias):
        # src_ref: (B, Hp, K) zero-y-haloed bf16 activations (lane-dense).
        # wdy(dy): (K, W*C)   bf16 block-Toeplitz weight for row offset dy.
        # bias   : (1, W*C)   f32 bias tiled across x.
        # Returns (B*H, W*C) f32 post-ReLU activations (batches stacked on rows).
        acc = jnp.zeros((B * H, WC), jnp.float32)
        for dy in range(3):
            rows = jnp.concatenate(
                [src_ref[b, dy:dy + H, :] for b in range(B)], axis=0)  # (B*H, K)
            acc = acc + jnp.dot(rows, wdy(dy),
                                preferred_element_type=jnp.float32)
        return jnp.maximum(acc + bias, 0.0)

    def store_interior(h):
        for b in range(B):
            slab_ref[b, 1:Hp - 1, :] = h[b * H:(b + 1) * H, :].astype(slab_ref.dtype)

    h = conv3x3_relu(slab0_ref, lambda dy: w1_ref[dy], bconv_ref[0:1, :])
    store_interior(h)
    h = conv3x3_relu(slab_ref, lambda dy: w23_ref[0, dy], bconv_ref[1:2, :])
    store_interior(h)
    h = conv3x3_relu(slab_ref, lambda dy: w23_ref[1, dy], bconv_ref[2:3, :])

    # Global average pool folded into the FC matmul: per-image row-sum, then
    # (B, W*C) @ (W*C, 128) in f32, scaled by 1/(H*W) after the matmul.
    sums = jnp.concatenate(
        [jnp.sum(h[b * H:(b + 1) * H, :], axis=0, keepdims=True) for b in range(B)],
        axis=0)                                                          # (B, W*C)
    logits = jnp.dot(sums, wfc_ref[...], preferred_element_type=jnp.float32)
    o_ref[...] = logits * inv_hw + bfc_ref[...]


# ----------------------------------------------------------------------------
# One-time host-side packing of the PyTorch-equivalent parameters into the
# lane-dense kernel layout (block-Toeplitz conv weights, tiled biases, padded
# pool-folded fc weight).  Runs once, outside the jitted forward.
# ----------------------------------------------------------------------------
def pack_params(params, H, W):
    C = params["w2"].shape[3]
    Nout = params["wfc"].shape[1]
    NOUT_PAD = 128

    def toeplitz(k):
        # k: (3, 3, Cin, Cout) HWIO.  Output m[dy, xi*Cin+ci, xo*Cout+co] =
        # k[dy, xi-xo+1, ci, co] (zero outside the band -> "same" x-padding).
        k = np.asarray(k, np.float32)
        kh, kw, cin, cout = k.shape
        m = np.zeros((kh, W * cin, W * cout), np.float32)
        for dy in range(kh):
            for xo in range(W):
                for dx in range(kw):
                    xi = xo + dx - 1
                    if 0 <= xi < W:
                        m[dy, xi * cin:(xi + 1) * cin,
                          xo * cout:(xo + 1) * cout] = k[dy, dx]
        return m

    w1t = toeplitz(params["w1"])                                        # (3, W, W*C)
    w23t = np.stack([toeplitz(params["w2"]), toeplitz(params["w3"])])   # (2, 3, W*C, W*C)
    bconv = np.stack([np.tile(np.asarray(params["b%d" % i], np.float32), W)
                      for i in (1, 2, 3)])                              # (3, W*C)

    wfc = np.asarray(params["wfc"], np.float32)                         # (C, Nout)
    wfc_g = np.zeros((W * C, NOUT_PAD), np.float32)                     # gather-over-x @ fc
    for x in range(W):
        wfc_g[x * C:(x + 1) * C, :Nout] = wfc
    bfc = np.zeros((1, NOUT_PAD), np.float32)
    bfc[0, :Nout] = np.asarray(params["bfc"], np.float32)

    packed = {
        "w1t": jnp.asarray(w1t, jnp.bfloat16),
        "w23t": jnp.asarray(w23t, jnp.bfloat16),
        "bconv": jnp.asarray(bconv),
        "wfc_g": jnp.asarray(wfc_g),
        "bfc": jnp.asarray(bfc),
    }
    return packed, Nout


# ----------------------------------------------------------------------------
# Wrapper: whole forward pass = a single no-grid pallas_call; everything lives
# in VMEM for the duration of the kernel.
# ----------------------------------------------------------------------------
@functools.partial(jax.jit, static_argnames=("nout",))
def small_cnn_forward(x_nchw, packed, *, nout: int = 10):
    B, _, H, W = x_nchw.shape
    WC = packed["w23t"].shape[-1]
    Hp = H + 2
    nout_pad = packed["bfc"].shape[1]

    # Single input channel -> (B, H, W), bf16 MXU input (no size-1 lane dim).
    x_b = x_nchw.reshape(B, H, W).astype(jnp.bfloat16)

    out = pl.pallas_call(
        _small_cnn_kernel,
        out_shape=jax.ShapeDtypeStruct((B, nout_pad), jnp.float32),
        scratch_shapes=[
            pltpu.VMEM((B, Hp, W), jnp.bfloat16),    # layer-1 input slab (Cin=1)
            pltpu.VMEM((B, Hp, WC), jnp.bfloat16),   # lane-dense activation slab
        ],
    )(x_b, packed["w1t"], packed["w23t"], packed["bconv"],
      packed["wfc_g"], packed["bfc"])
    return out[:, :nout]


def init_params(key):
    ks = jax.random.split(key, 8)
    return {
        "w1": jax.random.normal(ks[0], (3, 3, 1, 16), jnp.float32) * 0.1,
        "b1": jax.random.normal(ks[1], (16,), jnp.float32) * 0.01,
        "w2": jax.random.normal(ks[2], (3, 3, 16, 16), jnp.float32) * 0.1,
        "b2": jax.random.normal(ks[3], (16,), jnp.float32) * 0.01,
        "w3": jax.random.normal(ks[4], (3, 3, 16, 16), jnp.float32) * 0.1,
        "b3": jax.random.normal(ks[5], (16,), jnp.float32) * 0.01,
        "wfc": jax.random.normal(ks[6], (16, 10), jnp.float32) * 0.1,
        "bfc": jax.random.normal(ks[7], (10,), jnp.float32) * 0.01,
    }


# Pure-JAX f32 reference (matches PyTorch SmallCNN.forward).
def _reference_forward(x_nchw, p):
    x = jnp.transpose(x_nchw, (0, 2, 3, 1))
    for w, b in ((p["w1"], p["b1"]), (p["w2"], p["b2"]), (p["w3"], p["b3"])):
        x = jax.lax.conv_general_dilated(
            x, w, window_strides=(1, 1), padding="SAME",
            dimension_numbers=("NHWC", "HWIO", "NHWC"))
        x = jnp.maximum(x + b, 0.0)
    pooled = jnp.mean(x, axis=(1, 2))
    return pooled @ p["wfc"] + p["bfc"]


if __name__ == "__main__":
    key = jax.random.PRNGKey(0)
    kx, kp = jax.random.split(key)
    # PyTorch module: Conv2d(1, 16, ...) -> NCHW input with 1 channel.
    x = jax.random.normal(kx, (2, 1, 16, 16), jnp.float32)
    params = init_params(kp)
    packed, nout = pack_params(params, H=16, W=16)

    out = jax.block_until_ready(small_cnn_forward(x, packed, nout=nout))
    ref = jax.block_until_ready(_reference_forward(x, params))

    assert out.shape == (2, 10)
    # bf16 MXU inputs (activations + conv weights) vs. the f32 reference ->
    # deviations at the ~1e-3 level; accumulation, bias/ReLU, pooling and the
    # FC are all f32.
    assert jnp.allclose(out, ref, atol=2e-2, rtol=2e-2), "mismatch vs JAX reference"
    print("KERNEL_OK")
</pallas_src>

<mosaic_0001>
module attributes {stable_mosaic.version = 11 : i64} {
  func.func @_small_cnn_kernel(%arg0: memref<2x16x16xbf16, #tpu.memory_space<vmem>>, %arg1: memref<3x16x256xbf16, #tpu.memory_space<vmem>>, %arg2: memref<2x3x256x256xbf16, #tpu.memory_space<vmem>>, %arg3: memref<3x256xf32, #tpu.memory_space<vmem>>, %arg4: memref<256x128xf32, #tpu.memory_space<vmem>>, %arg5: memref<1x128xf32, #tpu.memory_space<vmem>>, %arg6: memref<2x128xf32, #tpu.memory_space<vmem>>, %arg7: memref<2x18x16xbf16, #tpu.memory_space<vmem>>, %arg8: memref<2x18x256xbf16, #tpu.memory_space<vmem>>) attributes {dimension_semantics = [], scalar_prefetch = 0 : i64, scratch_operands = 2 : i64, tpu.core_type = #tpu.core_type<tc>} {
    %cst = arith.constant 0.000000e+00 : bf16
    %0 = vector.broadcast %cst : bf16 to vector<2x1x16xbf16>
    %c0 = arith.constant 0 : index
    %c0_0 = arith.constant 0 : index
    %c0_1 = arith.constant 0 : index
    %1 = vector.load %arg7[%c0, %c0_0, %c0_1] : memref<2x18x16xbf16, #tpu.memory_space<vmem>>, vector<2x1x16xbf16>
    tpu.vector_store %arg7[%c0, %c0_0, %c0_1], %0 {strides = array<i32>} : memref<2x18x16xbf16, #tpu.memory_space<vmem>>, vector<2x1x16xbf16>,
    %cst_2 = arith.constant 0.000000e+00 : bf16
    %2 = vector.broadcast %cst_2 : bf16 to vector<2x1x16xbf16>
    %c0_3 = arith.constant 0 : index
    %c17 = arith.constant 17 : index
    %c0_4 = arith.constant 0 : index
    %3 = vector.load %arg7[%c0_3, %c17, %c0_4] : memref<2x18x16xbf16, #tpu.memory_space<vmem>>, vector<2x1x16xbf16>
    tpu.vector_store %arg7[%c0_3, %c17, %c0_4], %2 {strides = array<i32>} : memref<2x18x16xbf16, #tpu.memory_space<vmem>>, vector<2x1x16xbf16>,
    %cst_5 = arith.constant 0.000000e+00 : bf16
    %4 = vector.broadcast %cst_5 : bf16 to vector<2x1x256xbf16>
    %c0_6 = arith.constant 0 : index
    %c0_7 = arith.constant 0 : index
    %c0_8 = arith.constant 0 : index
    %5 = vector.load %arg8[%c0_6, %c0_7, %c0_8] : memref<2x18x256xbf16, #tpu.memory_space<vmem>>, vector<2x1x256xbf16>
    tpu.vector_store %arg8[%c0_6, %c0_7, %c0_8], %4 {strides = array<i32>} : memref<2x18x256xbf16, #tpu.memory_space<vmem>>, vector<2x1x256xbf16>,
    %cst_9 = arith.constant 0.000000e+00 : bf16
    %6 = vector.broadcast %cst_9 : bf16 to vector<2x1x256xbf16>
    %c0_10 = arith.constant 0 : index
    %c17_11 = arith.constant 17 : index
    %c0_12 = arith.constant 0 : index
    %7 = vector.load %arg8[%c0_10, %c17_11, %c0_12] : memref<2x18x256xbf16, #tpu.memory_space<vmem>>, vector<2x1x256xbf16>
    tpu.vector_store %arg8[%c0_10, %c17_11, %c0_12], %6 {strides = array<i32>} : memref<2x18x256xbf16, #tpu.memory_space<vmem>>, vector<2x1x256xbf16>,
    %c0_13 = arith.constant 0 : index
    %c0_14 = arith.constant 0 : index
    %c0_15 = arith.constant 0 : index
    %8 = vector.load %arg0[%c0_13, %c0_14, %c0_15] : memref<2x16x16xbf16, #tpu.memory_space<vmem>>, vector<2x16x16xbf16>
    %c0_16 = arith.constant 0 : index
    %c1 = arith.constant 1 : index
    %c0_17 = arith.constant 0 : index
    %9 = vector.load %arg7[%c0_16, %c1, %c0_17] : memref<2x18x16xbf16, #tpu.memory_space<vmem>>, vector<2x16x16xbf16>
    tpu.vector_store %arg7[%c0_16, %c1, %c0_17], %8 {strides = array<i32>} : memref<2x18x16xbf16, #tpu.memory_space<vmem>>, vector<2x16x16xbf16>,
    %c0_18 = arith.constant 0 : index
    %c0_19 = arith.constant 0 : index
    %10 = vector.load %arg3[%c0_18, %c0_19] : memref<3x256xf32, #tpu.memory_space<vmem>>, vector<1x256xf32>
    %cst_20 = arith.constant 0.000000e+00 : f32
    %11 = vector.broadcast %cst_20 : f32 to vector<32x256xf32>
    %c0_21 = arith.constant 0 : index
    %c0_22 = arith.constant 0 : index
    %c0_23 = arith.constant 0 : index
    %12 = vector.load %arg7[%c0_21, %c0_22, %c0_23] : memref<2x18x16xbf16, #tpu.memory_space<vmem>>, vector<1x16x16xbf16>
    %13 = vector.shape_cast %12 : vector<1x16x16xbf16> to vector<16x16xbf16>
    %c1_24 = arith.constant 1 : index
    %c0_25 = arith.constant 0 : index
    %c0_26 = arith.constant 0 : index
    %14 = vector.load %arg7[%c1_24, %c0_25, %c0_26] : memref<2x18x16xbf16, #tpu.memory_space<vmem>>, vector<1x16x16xbf16>
    %15 = vector.shape_cast %14 : vector<1x16x16xbf16> to vector<16x16xbf16>
    %16 = tpu.concatenate %13, %15 in 0 : vector<16x16xbf16>, vector<16x16xbf16> -> vector<32x16xbf16>
    %c0_27 = arith.constant 0 : index
    %c0_28 = arith.constant 0 : index
    %c0_29 = arith.constant 0 : index
    %17 = vector.load %arg1[%c0_27, %c0_28, %c0_29] : memref<3x16x256xbf16, #tpu.memory_space<vmem>>, vector<1x16x256xbf16>
    %18 = vector.shape_cast %17 : vector<1x16x256xbf16> to vector<16x256xbf16>
    %cst_30 = arith.constant dense<0.000000e+00> : vector<32x256xf32>
    %19 = tpu.matmul %16, %18, %cst_30 {dimension_numbers = #tpu.dot_dimension_numbers<[1], [0], [0], [1], [0, 0, 1, 1], [], []>} : vector<32x16xbf16>, vector<16x256xbf16>, vector<32x256xf32> -> vector<32x256xf32>
    %20 = arith.addf %11, %19 : vector<32x256xf32>
    %c0_31 = arith.constant 0 : index
    %c1_32 = arith.constant 1 : index
    %c0_33 = arith.constant 0 : index
    %21 = vector.load %arg7[%c0_31, %c1_32, %c0_33] : memref<2x18x16xbf16, #tpu.memory_space<vmem>>, vector<1x16x16xbf16>
    %22 = vector.shape_cast %21 : vector<1x16x16xbf16> to vector<16x16xbf16>
    %c1_34 = arith.constant 1 : index
    %c1_35 = arith.constant 1 : index
    %c0_36 = arith.constant 0 : index
    %23 = vector.load %arg7[%c1_34, %c1_35, %c0_36] : memref<2x18x16xbf16, #tpu.memory_space<vmem>>, vector<1x16x16xbf16>
    %24 = vector.shape_cast %23 : vector<1x16x16xbf16> to vector<16x16xbf16>
    %25 = tpu.concatenate %22, %24 in 0 : vector<16x16xbf16>, vector<16x16xbf16> -> vector<32x16xbf16>
    %c1_37 = arith.constant 1 : index
    %c0_38 = arith.constant 0 : index
    %c0_39 = arith.constant 0 : index
    %26 = vector.load %arg1[%c1_37, %c0_38, %c0_39] : memref<3x16x256xbf16, #tpu.memory_space<vmem>>, vector<1x16x256xbf16>
    %27 = vector.shape_cast %26 : vector<1x16x256xbf16> to vector<16x256xbf16>
    %cst_40 = arith.constant dense<0.000000e+00> : vector<32x256xf32>
    %28 = tpu.matmul %25, %27, %cst_40 {dimension_numbers = #tpu.dot_dimension_numbers<[1], [0], [0], [1], [0, 0, 1, 1], [], []>} : vector<32x16xbf16>, vector<16x256xbf16>, vector<32x256xf32> -> vector<32x256xf32>
    %29 = arith.addf %20, %28 : vector<32x256xf32>
    %c0_41 = arith.constant 0 : index
    %c2 = arith.constant 2 : index
    %c0_42 = arith.constant 0 : index
    %30 = vector.load %arg7[%c0_41, %c2, %c0_42] : memref<2x18x16xbf16, #tpu.memory_space<vmem>>, vector<1x16x16xbf16>
    %31 = vector.shape_cast %30 : vector<1x16x16xbf16> to vector<16x16xbf16>
    %c1_43 = arith.constant 1 : index
    %c2_44 = arith.constant 2 : index
    %c0_45 = arith.constant 0 : index
    %32 = vector.load %arg7[%c1_43, %c2_44, %c0_45] : memref<2x18x16xbf16, #tpu.memory_space<vmem>>, vector<1x16x16xbf16>
    %33 = vector.shape_cast %32 : vector<1x16x16xbf16> to vector<16x16xbf16>
    %34 = tpu.concatenate %31, %33 in 0 : vector<16x16xbf16>, vector<16x16xbf16> -> vector<32x16xbf16>
    %c2_46 = arith.constant 2 : index
    %c0_47 = arith.constant 0 : index
    %c0_48 = arith.constant 0 : index
    %35 = vector.load %arg1[%c2_46, %c0_47, %c0_48] : memref<3x16x256xbf16, #tpu.memory_space<vmem>>, vector<1x16x256xbf16>
    %36 = vector.shape_cast %35 : vector<1x16x256xbf16> to vector<16x256xbf16>
    %cst_49 = arith.constant dense<0.000000e+00> : vector<32x256xf32>
    %37 = tpu.matmul %34, %36, %cst_49 {dimension_numbers = #tpu.dot_dimension_numbers<[1], [0], [0], [1], [0, 0, 1, 1], [], []>} : vector<32x16xbf16>, vector<16x256xbf16>, vector<32x256xf32> -> vector<32x256xf32>
    %38 = arith.addf %29, %37 : vector<32x256xf32>
    %39 = vector.broadcast %10 : vector<1x256xf32> to vector<32x256xf32>
    %40 = arith.addf %38, %39 : vector<32x256xf32>
    %cst_50 = arith.constant 0.000000e+00 : f32
    %41 = vector.broadcast %cst_50 : f32 to vector<32x256xf32>
    %42 = arith.maximumf %40, %41 : vector<32x256xf32>
    %43 = vector.extract_strided_slice %42 {offsets = [0, 0], sizes = [16, 256], strides = [1, 1]} : vector<32x256xf32> to vector<16x256xf32>
    %44 = arith.truncf %43 : vector<16x256xf32> to vector<16x256xbf16>
    %c0_51 = arith.constant 0 : index
    %c1_52 = arith.constant 1 : index
    %c0_53 = arith.constant 0 : index
    %45 = vector.load %arg8[%c0_51, %c1_52, %c0_53] : memref<2x18x256xbf16, #tpu.memory_space<vmem>>, vector<1x16x256xbf16>
    %46 = vector.shape_cast %45 : vector<1x16x256xbf16> to vector<16x256xbf16>
    %47 = vector.shape_cast %44 : vector<16x256xbf16> to vector<1x16x256xbf16>
    tpu.vector_store %arg8[%c0_51, %c1_52, %c0_53], %47 {strides = array<i32>} : memref<2x18x256xbf16, #tpu.memory_space<vmem>>, vector<1x16x256xbf16>,
    %48 = vector.extract_strided_slice %42 {offsets = [16, 0], sizes = [16, 256], strides = [1, 1]} : vector<32x256xf32> to vector<16x256xf32>
    %49 = arith.truncf %48 : vector<16x256xf32> to vector<16x256xbf16>
    %c1_54 = arith.constant 1 : index
    %c1_55 = arith.constant 1 : index
    %c0_56 = arith.constant 0 : index
    %50 = vector.load %arg8[%c1_54, %c1_55, %c0_56] : memref<2x18x256xbf16, #tpu.memory_space<vmem>>, vector<1x16x256xbf16>
    %51 = vector.shape_cast %50 : vector<1x16x256xbf16> to vector<16x256xbf16>
    %52 = vector.shape_cast %49 : vector<16x256xbf16> to vector<1x16x256xbf16>
    tpu.vector_store %arg8[%c1_54, %c1_55, %c0_56], %52 {strides = array<i32>} : memref<2x18x256xbf16, #tpu.memory_space<vmem>>, vector<1x16x256xbf16>,
    %c1_57 = arith.constant 1 : index
    %c0_58 = arith.constant 0 : index
    %53 = vector.load %arg3[%c1_57, %c0_58] : memref<3x256xf32, #tpu.memory_space<vmem>>, vector<1x256xf32>
    %cst_59 = arith.constant 0.000000e+00 : f32
    %54 = vector.broadcast %cst_59 : f32 to vector<32x256xf32>
    %c0_60 = arith.constant 0 : index
    %c0_61 = arith.constant 0 : index
    %c0_62 = arith.constant 0 : index
    %55 = vector.load %arg8[%c0_60, %c0_61, %c0_62] : memref<2x18x256xbf16, #tpu.memory_space<vmem>>, vector<1x16x256xbf16>
    %56 = vector.shape_cast %55 : vector<1x16x256xbf16> to vector<16x256xbf16>
    %c1_63 = arith.constant 1 : index
    %c0_64 = arith.constant 0 : index
    %c0_65 = arith.constant 0 : index
    %57 = vector.load %arg8[%c1_63, %c0_64, %c0_65] : memref<2x18x256xbf16, #tpu.memory_space<vmem>>, vector<1x16x256xbf16>
    %58 = vector.shape_cast %57 : vector<1x16x256xbf16> to vector<16x256xbf16>
    %59 = tpu.concatenate %56, %58 in 0 : vector<16x256xbf16>, vector<16x256xbf16> -> vector<32x256xbf16>
    %c0_66 = arith.constant 0 : index
    %c0_67 = arith.constant 0 : index
    %c0_68 = arith.constant 0 : index
    %c0_69 = arith.constant 0 : index
    %60 = vector.load %arg2[%c0_66, %c0_67, %c0_68, %c0_69] : memref<2x3x256x256xbf16, #tpu.memory_space<vmem>>, vector<1x1x256x256xbf16>
    %61 = vector.shape_cast %60 : vector<1x1x256x256xbf16> to vector<256x256xbf16>
    %cst_70 = arith.constant dense<0.000000e+00> : vector<32x256xf32>
    %62 = tpu.matmul %59, %61, %cst_70 {dimension_numbers = #tpu.dot_dimension_numbers<[1], [0], [0], [1], [0, 0, 1, 1], [], []>} : vector<32x256xbf16>, vector<256x256xbf16>, vector<32x256xf32> -> vector<32x256xf32>
    %63 = arith.addf %54, %62 : vector<32x256xf32>
    %c0_71 = arith.constant 0 : index
    %c1_72 = arith.constant 1 : index
    %c0_73 = arith.constant 0 : index
    %64 = vector.load %arg8[%c0_71, %c1_72, %c0_73] : memref<2x18x256xbf16, #tpu.memory_space<vmem>>, vector<1x16x256xbf16>
    %65 = vector.shape_cast %64 : vector<1x16x256xbf16> to vector<16x256xbf16>
    %c1_74 = arith.constant 1 : index
    %c1_75 = arith.constant 1 : index
    %c0_76 = arith.constant 0 : index
    %66 = vector.load %arg8[%c1_74, %c1_75, %c0_76] : memref<2x18x256xbf16, #tpu.memory_space<vmem>>, vector<1x16x256xbf16>
    %67 = vector.shape_cast %66 : vector<1x16x256xbf16> to vector<16x256xbf16>
    %68 = tpu.concatenate %65, %67 in 0 : vector<16x256xbf16>, vector<16x256xbf16> -> vector<32x256xbf16>
    %c0_77 = arith.constant 0 : index
    %c1_78 = arith.constant 1 : index
    %c0_79 = arith.constant 0 : index
    %c0_80 = arith.constant 0 : index
    %69 = vector.load %arg2[%c0_77, %c1_78, %c0_79, %c0_80] : memref<2x3x256x256xbf16, #tpu.memory_space<vmem>>, vector<1x1x256x256xbf16>
    %70 = vector.shape_cast %69 : vector<1x1x256x256xbf16> to vector<256x256xbf16>
    %cst_81 = arith.constant dense<0.000000e+00> : vector<32x256xf32>
    %71 = tpu.matmul %68, %70, %cst_81 {dimension_numbers = #tpu.dot_dimension_numbers<[1], [0], [0], [1], [0, 0, 1, 1], [], []>} : vector<32x256xbf16>, vector<256x256xbf16>, vector<32x256xf32> -> vector<32x256xf32>
    %72 = arith.addf %63, %71 : vector<32x256xf32>
    %c0_82 = arith.constant 0 : index
    %c2_83 = arith.constant 2 : index
    %c0_84 = arith.constant 0 : index
    %73 = vector.load %arg8[%c0_82, %c2_83, %c0_84] : memref<2x18x256xbf16, #tpu.memory_space<vmem>>, vector<1x16x256xbf16>
    %74 = vector.shape_cast %73 : vector<1x16x256xbf16> to vector<16x256xbf16>
    %c1_85 = arith.constant 1 : index
    %c2_86 = arith.constant 2 : index
    %c0_87 = arith.constant 0 : index
    %75 = vector.load %arg8[%c1_85, %c2_86, %c0_87] : memref<2x18x256xbf16, #tpu.memory_space<vmem>>, vector<1x16x256xbf16>
    %76 = vector.shape_cast %75 : vector<1x16x256xbf16> to vector<16x256xbf16>
    %77 = tpu.concatenate %74, %76 in 0 : vector<16x256xbf16>, vector<16x256xbf16> -> vector<32x256xbf16>
    %c0_88 = arith.constant 0 : index
    %c2_89 = arith.constant 2 : index
    %c0_90 = arith.constant 0 : index
    %c0_91 = arith.constant 0 : index
    %78 = vector.load %arg2[%c0_88, %c2_89, %c0_90, %c0_91] : memref<2x3x256x256xbf16, #tpu.memory_space<vmem>>, vector<1x1x256x256xbf16>
    %79 = vector.shape_cast %78 : vector<1x1x256x256xbf16> to vector<256x256xbf16>
    %cst_92 = arith.constant dense<0.000000e+00> : vector<32x256xf32>
    %80 = tpu.matmul %77, %79, %cst_92 {dimension_numbers = #tpu.dot_dimension_numbers<[1], [0], [0], [1], [0, 0, 1, 1], [], []>} : vector<32x256xbf16>, vector<256x256xbf16>, vector<32x256xf32> -> vector<32x256xf32>
    %81 = arith.addf %72, %80 : vector<32x256xf32>
    %82 = vector.broadcast %53 : vector<1x256xf32> to vector<32x256xf32>
    %83 = arith.addf %81, %82 : vector<32x256xf32>
    %cst_93 = arith.constant 0.000000e+00 : f32
    %84 = vector.broadcast %cst_93 : f32 to vector<32x256xf32>
    %85 = arith.maximumf %83, %84 : vector<32x256xf32>
    %86 = vector.extract_strided_slice %85 {offsets = [0, 0], sizes = [16, 256], strides = [1, 1]} : vector<32x256xf32> to vector<16x256xf32>
    %87 = arith.truncf %86 : vector<16x256xf32> to vector<16x256xbf16>
    %c0_94 = arith.constant 0 : index
    %c1_95 = arith.constant 1 : index
    %c0_96 = arith.constant 0 : index
    %88 = vector.load %arg8[%c0_94, %c1_95, %c0_96] : memref<2x18x256xbf16, #tpu.memory_space<vmem>>, vector<1x16x256xbf16>
    %89 = vector.shape_cast %88 : vector<1x16x256xbf16> to vector<16x256xbf16>
    %90 = vector.shape_cast %87 : vector<16x256xbf16> to vector<1x16x256xbf16>
    tpu.vector_store %arg8[%c0_94, %c1_95, %c0_96], %90 {strides = array<i32>} : memref<2x18x256xbf16, #tpu.memory_space<vmem>>, vector<1x16x256xbf16>,
    %91 = vector.extract_strided_slice %85 {offsets = [16, 0], sizes = [16, 256], strides = [1, 1]} : vector<32x256xf32> to vector<16x256xf32>
    %92 = arith.truncf %91 : vector<16x256xf32> to vector<16x256xbf16>
    %c1_97 = arith.constant 1 : index
    %c1_98 = arith.constant 1 : index
    %c0_99 = arith.constant 0 : index
    %93 = vector.load %arg8[%c1_97, %c1_98, %c0_99] : memref<2x18x256xbf16, #tpu.memory_space<vmem>>, vector<1x16x256xbf16>
    %94 = vector.shape_cast %93 : vector<1x16x256xbf16> to vector<16x256xbf16>
    %95 = vector.shape_cast %92 : vector<16x256xbf16> to vector<1x16x256xbf16>
    tpu.vector_store %arg8[%c1_97, %c1_98, %c0_99], %95 {strides = array<i32>} : memref<2x18x256xbf16, #tpu.memory_space<vmem>>, vector<1x16x256xbf16>,
    %c2_100 = arith.constant 2 : index
    %c0_101 = arith.constant 0 : index
    %96 = vector.load %arg3[%c2_100, %c0_101] : memref<3x256xf32, #tpu.memory_space<vmem>>, vector<1x256xf32>
    %cst_102 = arith.constant 0.000000e+00 : f32
    %97 = vector.broadcast %cst_102 : f32 to vector<32x256xf32>
    %c0_103 = arith.constant 0 : index
    %c0_104 = arith.constant 0 : index
    %c0_105 = arith.constant 0 : index
    %98 = vector.load %arg8[%c0_103, %c0_104, %c0_105] : memref<2x18x256xbf16, #tpu.memory_space<vmem>>, vector<1x16x256xbf16>
    %99 = vector.shape_cast %98 : vector<1x16x256xbf16> to vector<16x256xbf16>
    %c1_106 = arith.constant 1 : index
    %c0_107 = arith.constant 0 : index
    %c0_108 = arith.constant 0 : index
    %100 = vector.load %arg8[%c1_106, %c0_107, %c0_108] : memref<2x18x256xbf16, #tpu.memory_space<vmem>>, vector<1x16x256xbf16>
    %101 = vector.shape_cast %100 : vector<1x16x256xbf16> to vector<16x256xbf16>
    %102 = tpu.concatenate %99, %101 in 0 : vector<16x256xbf16>, vector<16x256xbf16> -> vector<32x256xbf16>
    %c1_109 = arith.constant 1 : index
    %c0_110 = arith.constant 0 : index
    %c0_111 = arith.constant 0 : index
    %c0_112 = arith.constant 0 : index
    %103 = vector.load %arg2[%c1_109, %c0_110, %c0_111, %c0_112] : memref<2x3x256x256xbf16, #tpu.memory_space<vmem>>, vector<1x1x256x256xbf16>
    %104 = vector.shape_cast %103 : vector<1x1x256x256xbf16> to vector<256x256xbf16>
    %cst_113 = arith.constant dense<0.000000e+00> : vector<32x256xf32>
    %105 = tpu.matmul %102, %104, %cst_113 {dimension_numbers = #tpu.dot_dimension_numbers<[1], [0], [0], [1], [0, 0, 1, 1], [], []>} : vector<32x256xbf16>, vector<256x256xbf16>, vector<32x256xf32> -> vector<32x256xf32>
    %106 = arith.addf %97, %105 : vector<32x256xf32>
    %c0_114 = arith.constant 0 : index
    %c1_115 = arith.constant 1 : index
    %c0_116 = arith.constant 0 : index
    %107 = vector.load %arg8[%c0_114, %c1_115, %c0_116] : memref<2x18x256xbf16, #tpu.memory_space<vmem>>, vector<1x16x256xbf16>
    %108 = vector.shape_cast %107 : vector<1x16x256xbf16> to vector<16x256xbf16>
    %c1_117 = arith.constant 1 : index
    %c1_118 = arith.constant 1 : index
    %c0_119 = arith.constant 0 : index
    %109 = vector.load %arg8[%c1_117, %c1_118, %c0_119] : memref<2x18x256xbf16, #tpu.memory_space<vmem>>, vector<1x16x256xbf16>
    %110 = vector.shape_cast %109 : vector<1x16x256xbf16> to vector<16x256xbf16>
    %111 = tpu.concatenate %108, %110 in 0 : vector<16x256xbf16>, vector<16x256xbf16> -> vector<32x256xbf16>
    %c1_120 = arith.constant 1 : index
    %c1_121 = arith.constant 1 : index
    %c0_122 = arith.constant 0 : index
    %c0_123 = arith.constant 0 : index
    %112 = vector.load %arg2[%c1_120, %c1_121, %c0_122, %c0_123] : memref<2x3x256x256xbf16, #tpu.memory_space<vmem>>, vector<1x1x256x256xbf16>
    %113 = vector.shape_cast %112 : vector<1x1x256x256xbf16> to vector<256x256xbf16>
    %cst_124 = arith.constant dense<0.000000e+00> : vector<32x256xf32>
    %114 = tpu.matmul %111, %113, %cst_124 {dimension_numbers = #tpu.dot_dimension_numbers<[1], [0], [0], [1], [0, 0, 1, 1], [], []>} : vector<32x256xbf16>, vector<256x256xbf16>, vector<32x256xf32> -> vector<32x256xf32>
    %115 = arith.addf %106, %114 : vector<32x256xf32>
    %c0_125 = arith.constant 0 : index
    %c2_126 = arith.constant 2 : index
    %c0_127 = arith.constant 0 : index
    %116 = vector.load %arg8[%c0_125, %c2_126, %c0_127] : memref<2x18x256xbf16, #tpu.memory_space<vmem>>, vector<1x16x256xbf16>
    %117 = vector.shape_cast %116 : vector<1x16x256xbf16> to vector<16x256xbf16>
    %c1_128 = arith.constant 1 : index
    %c2_129 = arith.constant 2 : index
    %c0_130 = arith.constant 0 : index
    %118 = vector.load %arg8[%c1_128, %c2_129, %c0_130] : memref<2x18x256xbf16, #tpu.memory_space<vmem>>, vector<1x16x256xbf16>
    %119 = vector.shape_cast %118 : vector<1x16x256xbf16> to vector<16x256xbf16>
    %120 = tpu.concatenate %117, %119 in 0 : vector<16x256xbf16>, vector<16x256xbf16> -> vector<32x256xbf16>
    %c1_131 = arith.constant 1 : index
    %c2_132 = arith.constant 2 : index
    %c0_133 = arith.constant 0 : index
    %c0_134 = arith.constant 0 : index
    %121 = vector.load %arg2[%c1_131, %c2_132, %c0_133, %c0_134] : memref<2x3x256x256xbf16, #tpu.memory_space<vmem>>, vector<1x1x256x256xbf16>
    %122 = vector.shape_cast %121 : vector<1x1x256x256xbf16> to vector<256x256xbf16>
    %cst_135 = arith.constant dense<0.000000e+00> : vector<32x256xf32>
    %123 = tpu.matmul %120, %122, %cst_135 {dimension_numbers = #tpu.dot_dimension_numbers<[1], [0], [0], [1], [0, 0, 1, 1], [], []>} : vector<32x256xbf16>, vector<256x256xbf16>, vector<32x256xf32> -> vector<32x256xf32>
    %124 = arith.addf %115, %123 : vector<32x256xf32>
    %125 = vector.broadcast %96 : vector<1x256xf32> to vector<32x256xf32>
    %126 = arith.addf %124, %125 : vector<32x256xf32>
    %cst_136 = arith.constant 0.000000e+00 : f32
    %127 = vector.broadcast %cst_136 : f32 to vector<32x256xf32>
    %128 = arith.maximumf %126, %127 : vector<32x256xf32>
    %129 = vector.extract_strided_slice %128 {offsets = [0, 0], sizes = [16, 256], strides = [1, 1]} : vector<32x256xf32> to vector<16x256xf32>
    %cst_137 = arith.constant dense<0.000000e+00> : vector<256xf32>
    %130 = vector.multi_reduction <add>, %129, %cst_137 [0] : vector<16x256xf32> to vector<256xf32>
    %131 = vector.shape_cast %130 : vector<256xf32> to vector<1x256xf32>
    %132 = vector.extract_strided_slice %128 {offsets = [16, 0], sizes = [16, 256], strides = [1, 1]} : vector<32x256xf32> to vector<16x256xf32>
    %cst_138 = arith.constant dense<0.000000e+00> : vector<256xf32>
    %133 = vector.multi_reduction <add>, %132, %cst_138 [0] : vector<16x256xf32> to vector<256xf32>
    %134 = vector.shape_cast %133 : vector<256xf32> to vector<1x256xf32>
    %135 = tpu.concatenate %131, %134 in 0 : vector<1x256xf32>, vector<1x256xf32> -> vector<2x256xf32>
    %c0_139 = arith.constant 0 : index
    %c0_140 = arith.constant 0 : index
    %136 = vector.load %arg4[%c0_139, %c0_140] : memref<256x128xf32, #tpu.memory_space<vmem>>, vector<256x128xf32>
    %cst_141 = arith.constant dense<0.000000e+00> : vector<2x128xf32>
    %137 = tpu.matmul %135, %136, %cst_141 {dimension_numbers = #tpu.dot_dimension_numbers<[1], [0], [0], [1], [0, 0, 1, 1], [], []>} : vector<2x256xf32>, vector<256x128xf32>, vector<2x128xf32> -> vector<2x128xf32>
    %cst_142 = arith.constant 3.906250e-03 : f32
    %138 = vector.broadcast %cst_142 : f32 to vector<2x128xf32>
    %139 = arith.mulf %137, %138 : vector<2x128xf32>
    %c0_143 = arith.constant 0 : index
    %c0_144 = arith.constant 0 : index
    %140 = vector.load %arg5[%c0_143, %c0_144] : memref<1x128xf32, #tpu.memory_space<vmem>>, vector<1x128xf32>
    %141 = vector.broadcast %140 : vector<1x128xf32> to vector<2x128xf32>
    %142 = arith.addf %139, %141 : vector<2x128xf32>
    %c0_145 = arith.constant 0 : index
    %c0_146 = arith.constant 0 : index
    %143 = vector.load %arg6[%c0_145, %c0_146] : memref<2x128xf32, #tpu.memory_space<vmem>>, vector<2x128xf32>
    tpu.vector_store %arg6[%c0_145, %c0_146], %142 {strides = array<i32>} : memref<2x128xf32, #tpu.memory_space<vmem>>, vector<2x128xf32>,
    return
  }
}

</mosaic_0001>

<bundles_post_ra>
// kernel: small_cnn_forward.1
= control target key start
LH: loop header
LB: loop body
LE: loop exit
PB: predicated region body
PF: predicated region fallthrough
CT: control target
= control target key end

     0   :  { %11 = vsyncpa [#allocation5], 0  ;;  %s3657_s0 = inlined_call_operand.vmem [shape: bf16[2,16,16], index: 0, kind: input, shape index: {}]   ;;  %s3658_s1 = inlined_call_operand.vmem [shape: bf16[3,16,256], index: 1, kind: input, shape index: {}]   ;;  %s3659_s2 = inlined_call_operand.hbm [shape: bf16[2,3,256,256], index: 2, kind: input, shape index: {}]   ;;  %s3660_s3 = inlined_call_operand.vmem [shape: f32[3,256], index: 3, kind: input, shape index: {}]   ;;  %s3661_s4 = inlined_call_operand.hbm [shape: f32[256,128], index: 4, kind: input, shape index: {}]   ;;  %s3662_s5 = inlined_call_operand.vmem [shape: f32[1,128], index: 5, kind: input, shape index: {}]   ;;  %s3663_s6 = inlined_call_operand.hbm [shape: f32[2,128], index: 6, kind: output, shape index: {}]  }
   0x1   :  { %12 = vsyncpa [#allocation8], 0 }
   0x2   :  { %13 = vsyncpa [#allocation6], 0  ;;  %s3321_s21 = smov [#allocation4]   ;;  %s3249_s25 = scalar_lea.hbm %s3659_s2, 24576 }
   0x3   :  { %s23_s22 = sshll.u32 %s3321_s21, 4  ;;  %p3250_p0 = scmp.ne.s32.totalorder %s3659_s2, %s3249_s25  ;;  %s24_s22 = int_to_ptr.vmem [resolvable:$true] %s23_s22 }
   0x4   :  { %p3253_p1 = scmp.lt.u32.totalorder %s3249_s25, %s3659_s2 }
   0x6   :  { %p3255_p2 = pnand %p3253_p1, %p3250_p0 }
   0x8   :  { %3258 = shalt.err (!%p3255_p2)
}
   0x9   :  { %s3259_s30 = scalar_lea.vmem %s24_s22, 24576  ;;  %p3264_p4 = scmp.lt.s32.totalorder %s24_s22, %s24_s22 }
   0xa   :  { %p3260_p3 = scmp.ne.s32.totalorder %s24_s22, %s3259_s30  ;;  %p3265_p5 = scmp.lt.s32.totalorder %s3259_s30, %s3259_s30 }
   0xc   :  { %p3266_p6 = por %p3265_p5, %p3264_p4 }
   0xe   :  { %p3267_p7 = pnand %p3266_p6, %p3260_p3 }
  0x10   :  { %3270 = shalt.err (!%p3267_p7)
}
  0x11   :  { %s3322_s7 = smov 128   ;;  %s3323_s8 = smov 8  }
  0x12   :  { %29 = dma.hbm_to_vmem [thread:$0]  %s3659_s2, 24576, %s24_s22, [#allocation5], %s3322_s7, %s3322_s7, %s3323_s8  }
  0x13   :  { %s3324_s11 = smov [#allocation7]   ;;  %s3271_s15 = scalar_lea.hbm %s3661_s4, 4096 }
  0x14   :  { %s37_s12 = sshll.u32 %s3324_s11, 4  ;;  %p3272_p8 = scmp.ne.s32.totalorder %s3661_s4, %s3271_s15  ;;  %s38_s12 = int_to_ptr.vmem [resolvable:$true] %s37_s12 }
  0x15   :  { %p3275_p9 = scmp.lt.u32.totalorder %s3271_s15, %s3661_s4 }
  0x17   :  { %p3277_p10 = pnand %p3275_p9, %p3272_p8 }
  0x19   :  { %3280 = shalt.err (!%p3277_p10)
}
  0x1a   :  { %s3281_s20 = scalar_lea.vmem %s38_s12, 4096  ;;  %p3286_p12 = scmp.lt.s32.totalorder %s38_s12, %s38_s12 }
  0x1b   :  { %p3282_p11 = scmp.ne.s32.totalorder %s38_s12, %s3281_s20  ;;  %p3287_p13 = scmp.lt.s32.totalorder %s3281_s20, %s3281_s20 }
  0x1d   :  { %p3288_p0 = por %p3287_p13, %p3286_p12 }
  0x1f   :  { %p3289_p1 = pnand %p3288_p0, %p3282_p11 }
  0x21   :  { %3292 = shalt.err (!%p3289_p1)
}
  0x22   :  { %43 = dma.hbm_to_vmem [thread:$0]  %s3661_s4, 4096, %s38_s12, [#allocation8], %s3322_s7, %s3322_s7, %s3323_s8  }
  0x23   :  { %3315 = dma.done.wait [#allocation5], 24576  }
  0x24   :  { %3316 = vsyncadd [#allocation5], 4294942720 }
  0x25   :  { %3317 = dma.done.wait [#allocation8], 4096  }
  0x26   :  { %3318 = vsyncadd [#allocation8], 4294963200  ;;  %v3325_v0 = vmov 0   ;;  %vm53_vm0 = vcmask 122880   ;;  %vm54_vm1 = vsmask.f32 256 }
  0x27   :  { %325 = vmatprep.mubr.bf16.mxu0 %v3325_v0  ;;  %258 = vmatprep.mubr.bf16.mxu1 %v3325_v0  ;;  %vm3390_vm2 = vmand %vm53_vm0, %vm54_vm1  ;;  %v2939_v2 = vld [vmem:[%s3658_s1 + $0x4] ss:$8 sps:$4 sm:$0xff]   ;;  %vm62_vm3 = vsmask.f32 7938  ;;  %v2941_v3 = vld [vmem:[%s3658_s1] ss:$8 sps:$4 sm:$0xff]  }
  0x28   :  { %vm96_vm4 = vsmask.f32 4368  ;;  %293 = vmatprep.subr.bf16.mxu0 %v2939_v2  ;;  %v2944_v4 = vld [vmem:[%s3658_s1 + $0x24] ss:$8 sps:$4 sm:$0xff]   ;;  %v56_v5 = vld [vmem:[#allocation2] sm:$0x1]  ;;  %vm3424_vm6 = vmand %vm53_vm0, %vm62_vm3 }
  0x29   :  { %vm138_vm5 = vcmask 125952   ;;  %294 = vmatpush1.bf16.msra.mxu0 %v2941_v3  ;;  %v57_v6 = vsel %vm3390_vm2, 0, %v56_v5  ;;  %v92_v7 = vld [vmem:[%s3657_s0] sm:$0xf]  ;;  %v93_v8 = vld [vmem:[%s3657_s0 + $0x4] sm:$0xf]  ;;  %vm3430_vm7 = vmor %vm54_vm1, %vm96_vm4 }
  0x2a   :  { %380 = vmatprep.subr.bf16.mxu0 %v2944_v4  ;;  %58 = vst [vmem:[#allocation2] sm:$0x1] %v57_v6  ;;  %v99_v9 = vshrl.u32 %v92_v7, 16  ;;  %v102_v10 = vshll.u32 %v92_v7, 16  ;;  %v107_v11 = vshrl.u32 %v93_v8, 16  ;;  %v110_v12 = vshll.u32 %v93_v8, 16  ;;  %vm3439_vm8 = vmand %vm138_vm5, %vm62_vm3 }
  0x2b   :  { %v59_v13 = vld [vmem:[#allocation2 + $0xc] sm:$0x1]  ;;  %v94_v15 = vld [vmem:[%s3657_s0 + $0x8] sm:$0xf]  ;;  %v2948_v21 = vld [vmem:[%s3658_s1 + $0x14] ss:$8 sps:$4 sm:$0xff]  }
  0x2c   :  { %v60_v14 = vsel %vm3390_vm2, 0, %v59_v13  ;;  %v95_v16 = vld [vmem:[%s3657_s0 + $0xc] sm:$0xf]  ;;  %v101_v17 = vrot.slane %v99_v9, 7  ;;  %v109_v18 = vrot.slane %v107_v11, 7  ;;  %v116_v19 = vshrl.u32 %v94_v15, 16  ;;  %226 = vmatprep.subr.bf16.mxu1 %v2948_v21 }
  0x2d   :  { %61 = vst [vmem:[#allocation2 + $0xc] sm:$0x1] %v60_v14  ;;  %v119_v20 = vshll.u32 %v94_v15, 16  ;;  %v124_v24 = vshrl.u32 %v95_v16, 16  ;;  %v127_v25 = vshll.u32 %v95_v16, 16  ;;  %vm219_vm9 = vcmask 130048  }
  0x2e   :  { %v2950_v26 = vld [vmem:[%s3658_s1 + $0x10] ss:$8 sps:$4 sm:$0xff]   ;;  %v64_v27 = vld [vmem:[#allocation2 + $0x8] sm:$0x1]  ;;  %v104_v28 = vor.u32 %v102_v10, %v101_v17  ;;  %v105_v29 = vrot.slane %v101_v17, 4  ;;  %v112_v30 = vor.u32 %v110_v12, %v109_v18  ;;  %v118_v33 = vrot.slane %v116_v19, 7 }
  0x2f   :  { %v67_v31 = vld [vmem:[#allocation2 + $0x14] sm:$0x1]  ;;  %v126_v34 = vrot.slane %v124_v24, 7  ;;  %227 = vmatpush1.bf16.msra.mxu1 %v2950_v26  ;;  %v65_v35 = vsel %vm3424_vm6, 0, %v64_v27  ;;  %v114_v46 = vrot.slane %v109_v18, 4  ;;  %vm351_vm11 = vcmask 1046528  }
  0x30   :  { %v68_v36 = vsel %vm3424_vm6, 0, %v67_v31  ;;  %v113_v37 = vsel %vm3430_vm7, %v105_v29, %v112_v30  ;;  %66 = vst [vmem:[#allocation2 + $0x8] sm:$0x1] %v65_v35  ;;  %v2955_v38 = vld [vmem:[#allocation4 + $0x104] ss:$8 sps:$4 sm:$0xff]   ;;  %v121_v40 = vor.u32 %v119_v20, %v118_v33  ;;  %v122_v41 = vrot.slane %v118_v33, 4 }
  0x31   :  { %69 = vst [vmem:[#allocation2 + $0x14] sm:$0x1] %v68_v36  ;;  %v140_v39 = vld [vmem:[#allocation2] sm:$0xf]  ;;  %144 = vst.msk [vmem:[#allocation2 + $0x4] sm:$0xf] %vm138_vm5, %v113_v37  ;;  %v129_v42 = vor.u32 %v127_v25, %v126_v34  ;;  %863 = vmatprep.subr.bf16.mxu1 %v2955_v38 }
  0x32   :  { %v141_v43 = vsel %vm3439_vm8, %v104_v28, %v140_v39  ;;  %v131_v47 = vrot.slane %v126_v34, 4  ;;  %v2942_v54 = vld [vmem:[%s3658_s1 + $0x20] ss:$8 sps:$4 sm:$0xff]   ;;  %vm178_vm10 = vsmask.f32 7424  ;;  %vm70_vm12 = vcmask 1040384  }
  0x33   :  { %142 = vst [vmem:[#allocation2] sm:$0xf] %v141_v43  ;;  %v130_v44 = vsel %vm3430_vm7, %v122_v41, %v129_v42  ;;  %v2953_v7 = vld [vmem:[#allocation4 + $0x100] ss:$8 sps:$4 sm:$0xff]   ;;  %v2958_v9 = vld [vmem:[#allocation4 + $0x114] ss:$8 sps:$4 sm:$0xff]   ;;  %vm71_vm15 = vmand %vm70_vm12, %vm54_vm1 }
  0x34   :  { %v148_v45 = vld [vmem:[#allocation2 + $0xc] sm:$0xf]  ;;  %151 = vst.msk [vmem:[#allocation2 + $0x10] sm:$0xf] %vm138_vm5, %v130_v44  ;;  %v2956_v17 = vld [vmem:[#allocation4 + $0x110] ss:$8 sps:$4 sm:$0xff]   ;;  %vm82_vm5 = vmand %vm70_vm12, %vm62_vm3 }
  0x35   :  { %v149_v48 = vsel %vm3439_vm8, %v121_v40, %v148_v45  ;;  %v2961_v18 = vld [vmem:[#allocation4 + $0x124] ss:$8 sps:$4 sm:$0xff]   ;;  %v2959_v24 = vld [vmem:[#allocation4 + $0x120] ss:$8 sps:$4 sm:$0xff]   ;;  %v2964_v25 = vld [vmem:[#allocation4 + $0x134] ss:$8 sps:$4 sm:$0xff]  }
  0x36   :  { %150 = vst [vmem:[#allocation2 + $0xc] sm:$0xf] %v149_v48  ;;  %v2962_v29 = vld [vmem:[#allocation4 + $0x130] ss:$8 sps:$4 sm:$0xff]   ;;  %v2967_v30 = vld [vmem:[#allocation4 + $0x144] ss:$8 sps:$4 sm:$0xff]  }
  0x37   :  { %v145_v49 = vld [vmem:[#allocation2 + $0x8] sm:$0x1]  ;;  %v2970_v33 = vld [vmem:[#allocation4 + $0x154] ss:$8 sps:$4 sm:$0xff]   ;;  %v2968_v34 = vld [vmem:[#allocation4 + $0x150] ss:$8 sps:$4 sm:$0xff]  }
  0x38   :  { %v152_v50 = vld [vmem:[#allocation2 + $0x14] sm:$0x1]  ;;  %v157_v51 = vld [vmem:[#allocation2 + $0x4] sm:$0xf]  ;;  %v146_v52 = vsel %vm3390_vm2, %v114_v46, %v145_v49  ;;  %v2965_v32 = vld [vmem:[#allocation4 + $0x140] ss:$8 sps:$4 sm:$0xff]  }
  0x39   :  { %v153_v53 = vsel %vm3390_vm2, %v131_v47, %v152_v50  ;;  %147 = vst [vmem:[#allocation2 + $0x8] sm:$0x1] %v146_v52  ;;  %v2973_v35 = vld [vmem:[#allocation4 + $0x164] ss:$8 sps:$4 sm:$0xff]   ;;  %v2976_v36 = vld [vmem:[#allocation4 + $0x174] ss:$8 sps:$4 sm:$0xff]  }
  0x3a   :  { %154 = vst [vmem:[#allocation2 + $0x14] sm:$0x1] %v153_v53  ;;  %v156_v55 = vld [vmem:[#allocation2] sm:$0xf]  ;;  %v2979_v38 = vld [vmem:[#allocation4 + $0x184] ss:$8 sps:$4 sm:$0xff]  }
  0x3b   :  { %v2561_v56 = vcombine.low %v156_v55, %v157_v51  ;;  %v160_v57 = vld [vmem:[#allocation2 + $0x10] sm:$0xf]  ;;  %v346_v59 = vld [vmem:[#allocation2] sm:$0xe]  ;;  %vm72_vm13 = vcmask 1044484   ;;  %vm498_vm8 = vcmask 1043456  }
  0x3c   :  { %v2575_v4 = vcombine.low %v346_v59, %v157_v51  ;;  %v2974_v37 = vld [vmem:[#allocation4 + $0x170] ss:$8 sps:$4 sm:$0xff]   ;;  %v2977_v39 = vld [vmem:[#allocation4 + $0x180] ss:$8 sps:$4 sm:$0xff]   ;;  %vm73_vm14 = vsmask.f32 4352 }
  0x3d   :  { %v159_v58 = vld [vmem:[#allocation2 + $0xc] sm:$0xf]  ;;  %2573 = vmatmul.mubr.msk.bf16.vlgmr.msra.gmra.mrb[0].mxu0 %vm219_vm9, %v2561_v56  ;;  %v182_v60 = vshll.u32 %v2561_v56, 16  ;;  %v180_v62 = vshrl.u32 %v2561_v56, 16  ;;  %v2982_v40 = vld [vmem:[#allocation4 + $0x194] ss:$8 sps:$4 sm:$0xff]   ;;  %vm74_vm0 = vmand %vm72_vm13, %vm73_vm14 }
  0x3e   :  { %381 = vmatpush1.bf16.msra.mxu0 %v2942_v54  ;;  %335 = vmatprep.mubr.bf16.mxu0 %v3325_v0  ;;  %v2562_v61 = vcombine.low %v159_v58, %v160_v57  ;;  %v347_v13 = vld [vmem:[#allocation2 + $0xc] sm:$0xe]  ;;  %v352_v14 = vrot.slane %v2575_v4, 1  ;;  %v76_v41 = vld [vmem:[#allocation3] sm:$0x11]  ;;  %vm3481_vm4 = vmor %vm74_vm0, %vm71_vm15  ;;  %s3326_s21 = smov [#allocation9]  }
  0x3f   :  { %v184_v63 = vrot.slane %v182_v60, 1  ;;  %v2576_v22 = vcombine.low %v347_v13, %v160_v57  ;;  %vm83_vm2 = vsmask.f32 7954  ;;  %v2980_v42 = vld [vmem:[#allocation4 + $0x190] ss:$8 sps:$4 sm:$0xff]   ;;  %v77_v44 = vsel %vm3481_vm4, 0, %v76_v41 }
  0x40   :  { %v2951_v1 = vld [vmem:[#allocation2 + $0x8] ss:$0 sps:$4 sm:$0x11]   ;;  %v197_v2 = vshll.u32 %v2562_v61, 16  ;;  %v195_v8 = vshrl.u32 %v2562_v61, 16  ;;  %vm84_vm1 = vmand %vm72_vm13, %vm83_vm2  ;;  %s2551_s22 = sshll.u32 %s3326_s21, 4  ;;  %s2552_s22 = int_to_ptr.vmem [resolvable:$true] %s2551_s22 }
  0x41   :  { %v2952_v3 = vld [vmem:[#allocation2 + $0x14] ss:$0 sps:$4 sm:$0x11]   ;;  %v185_v5 = vor.u32 %v184_v63, %v180_v62  ;;  %v187_v6 = vshll.u32 %v2951_v1, 16  ;;  %v353_v16 = vrot.slane %v2951_v1, 1  ;;  %v358_v27 = vrot.slane %v2576_v22, 1  ;;  %vm85_vm6 = vmor %vm84_vm1, %vm82_vm5  ;;  %p3298_p3 = scmp.lt.s32.totalorder %s2552_s22, %s2552_s22 }
  0x42   :  { %v199_v11 = vrot.slane %v197_v2, 1  ;;  %v202_v12 = vshll.u32 %v2952_v3, 16  ;;  %v359_v28 = vrot.slane %v2952_v3, 1  ;;  %v86_v45 = vld [vmem:[#allocation3 + $0x10] sm:$0x11]  ;;  %v442_v1 = vlaneseq  ;;  %vm3503_vm13 = vmand %vm498_vm8, %vm62_vm3  ;;  %s3293_s23 = scalar_lea.vmem %s2552_s22, 32 }
  0x43   :  { %v189_v10 = vrot.slane %v187_v6, 1  ;;  %v354_v21 = vsel %vm351_vm11, %v352_v14, %v353_v16  ;;  %v89_v46 = vld [vmem:[#allocation3 + $0x28] sm:$0x11]  ;;  %78 = vst [vmem:[#allocation3] sm:$0x11] %v77_v44  ;;  %v87_v49 = vsel %vm85_vm6, 0, %v86_v45  ;;  %p3294_p2 = scmp.ne.s32.totalorder %s2552_s22, %s3293_s23  ;;  %p3299_p4 = scmp.lt.s32.totalorder %s3293_s23, %s3293_s23 }
  0x44   :  { %v200_v19 = vor.u32 %v199_v11, %v195_v8  ;;  %v204_v20 = vrot.slane %v202_v12, 1  ;;  %v360_v31 = vsel %vm351_vm11, %v358_v27, %v359_v28  ;;  %v2985_v47 = vld [vmem:[#allocation4 + $0x1a4] ss:$8 sps:$4 sm:$0xff]   ;;  %v2983_v48 = vld [vmem:[#allocation4 + $0x1a0] ss:$8 sps:$4 sm:$0xff]   ;;  %v90_v50 = vsel %vm85_vm6, 0, %v89_v46 }
  0x45   :  { %2574 = vmatmul.mubr.msk.bf16.gmra.mrb[4].mxu0 %vm219_vm9, %v2562_v61  ;;  %v190_v15 = vsel %vm178_vm10, %v185_v5, %v189_v10  ;;  %88 = vst [vmem:[#allocation3 + $0x10] sm:$0x11] %v87_v49  ;;  %91 = vst [vmem:[#allocation3 + $0x28] sm:$0x11] %v90_v50  ;;  %v2988_v51 = vld [vmem:[#allocation4 + $0x1b4] ss:$8 sps:$4 sm:$0xff]   ;;  %p3300_p5 = por %p3299_p4, %p3298_p3 }
  0x46   :  { %412 = vmatprep.mubr.bf16.mxu0 %v3325_v0  ;;  %2569 = vmatmul.mubr.msk.bf16.vlgmr.msra.gmra.mrb[0].mxu1 %vm219_vm9, %v190_v15  ;;  %v205_v26 = vsel %vm178_vm10, %v200_v19, %v204_v20  ;;  %v79_v52 = vld [vmem:[#allocation3 + $0x18] sm:$0x11]  ;;  %v2986_v53 = vld [vmem:[#allocation4 + $0x1b0] ss:$8 sps:$4 sm:$0xff]   ;;  %v2994_v57 = vld [vmem:[#allocation4 + $0x1d4] ss:$8 sps:$4 sm:$0xff]  }
  0x47   :  { %268 = vmatprep.mubr.bf16.mxu1 %v3325_v0  ;;  %864 = vmatpush1.bf16.msra.mxu1 %v2953_v7  ;;  %v80_v54 = vsel %vm3481_vm4, 0, %v79_v52  ;;  %v2991_v55 = vld [vmem:[#allocation4 + $0x1c4] ss:$8 sps:$4 sm:$0xff]   ;;  %v2989_v56 = vld [vmem:[#allocation4 + $0x1c0] ss:$8 sps:$4 sm:$0xff]   ;;  %v443_v2 = vshrl.u32 %v442_v1, 7  ;;  %p3301_p6 = pnand %p3300_p5, %p3294_p2 }
  0x48   :  { %865 = vmatprep.subr.bf16.mxu1 %v2958_v9  ;;  %81 = vst [vmem:[#allocation3 + $0x18] sm:$0x11] %v80_v54  ;;  %v2992_v58 = vld [vmem:[#allocation4 + $0x1d0] ss:$8 sps:$4 sm:$0xff]   ;;  %v2997_v59 = vld [vmem:[#allocation4 + $0x1e4] ss:$8 sps:$4 sm:$0xff]  }
  0x49   :  { %v2995_v60 = vld [vmem:[#allocation4 + $0x1e0] ss:$8 sps:$4 sm:$0xff]   ;;  %v2998_v61 = vld [vmem:[#allocation4 + $0x1f0] ss:$8 sps:$4 sm:$0xff]   ;;  %v3000_v62 = vld [vmem:[#allocation4 + $0x1f4] ss:$8 sps:$4 sm:$0xff]  }
  0x4a   :  { %v3004_v63 = vld [vmem:[#allocation4 + $0x4] ss:$8 sps:$4 sm:$0xff]   ;;  %v3493_v5 = vsub.s32 0, %v443_v2  ;;  %v155_v7 = vld [vmem:[%s3660_s3] ss:$4 sm:$0x3] }
  0x4b   :  { %866 = vmatpush1.bf16.msra.mxu1 %v2956_v17  ;;  %v3498_v8 = vsub.s32 1, %v443_v2  ;;  %v503_v50 = vld [vmem:[#allocation3] sm:$0xff] }
  0x4c   :  { %867 = vmatprep.subr.bf16.mxu1 %v2961_v18  ;;  %v445_v10 = vrot.slane %v155_v7, %v3493_v5 }
  0x4d   :  { %2581 = vmatmul.mubr.msk.bf16.vlgmr.msra.gmra.mrb[0].mxu0 %vm219_vm9, %v354_v21  ;;  %v449_v12 = vrot.slane %v155_v7, %v3498_v8 }
  0x4e   :  { %422 = vmatprep.mubr.bf16.mxu0 %v3325_v0  ;;  %2570 = vmatmul.mubr.msk.bf16.gmra.mrb[4].mxu1 %vm219_vm9, %v205_v26  ;;  %v2971_v0 = vld [vmem:[#allocation4 + $0x160] ss:$8 sps:$4 sm:$0xff]  }
  0x4f   :  { %868 = vmatpush1.bf16.msra.mxu1 %v2959_v24 }
  0x50   :  { %869 = vmatprep.subr.bf16.mxu1 %v2964_v25 }
  0x53   :  { %870 = vmatpush1.bf16.msra.mxu1 %v2962_v29 }
  0x54   :  { %871 = vmatprep.subr.bf16.mxu1 %v2967_v30 }
  0x55   :  { %2582 = vmatmul.mubr.msk.bf16.gmra.mrb[4].mxu0 %vm219_vm9, %v360_v31  ;;  %vm500_vm9 = vcmask 1047556  }
  0x56   :  { %vm501_vm14 = vmand %vm500_vm9, %vm83_vm2 }
  0x57   :  { %872 = vmatpush1.bf16.msra.mxu1 %v2965_v32  ;;  %vm3510_vm3 = vmor %vm501_vm14, %vm3503_vm13 }
  0x58   :  { %873 = vmatprep.subr.bf16.mxu1 %v2970_v33 }
  0x5b   :  { %874 = vmatpush1.bf16.msra.mxu1 %v2968_v34 }
  0x5c   :  { %875 = vmatprep.subr.bf16.mxu1 %v2973_v35 }
  0x5f   :  { %876 = vmatpush1.bf16.msra.mxu1 %v2971_v0 }
  0x60   :  { %877 = vmatprep.subr.bf16.mxu1 %v2976_v36 }
  0x63   :  { %878 = vmatpush1.bf16.msra.mxu1 %v2974_v37 }
  0x64   :  { %879 = vmatprep.subr.bf16.mxu1 %v2979_v38 }
  0x67   :  { %880 = vmatpush1.bf16.msra.mxu1 %v2977_v39 }
  0x68   :  { %881 = vmatprep.subr.bf16.mxu1 %v2982_v40 }
  0x6b   :  { %882 = vmatpush1.bf16.msra.mxu1 %v2980_v42 }
  0x6c   :  { %883 = vmatprep.subr.bf16.mxu1 %v2985_v47 }
  0x6f   :  { %884 = vmatpush1.bf16.msra.mxu1 %v2983_v48 }
  0x70   :  { %885 = vmatprep.subr.bf16.mxu1 %v2988_v51 }
  0x73   :  { %886 = vmatpush1.bf16.msra.mxu1 %v2986_v53 }
  0x74   :  { %887 = vmatprep.subr.bf16.mxu1 %v2991_v55 }
  0x77   :  { %888 = vmatpush1.bf16.msra.mxu1 %v2989_v56 }
  0x78   :  { %889 = vmatprep.subr.bf16.mxu1 %v2994_v57 }
  0x7b   :  { %890 = vmatpush1.bf16.msra.mxu1 %v2992_v58 }
  0x7c   :  { %891 = vmatprep.subr.bf16.mxu1 %v2997_v59  ;;  %v507_v59 = vld [vmem:[#allocation3 + $0x10] sm:$0x11] }
  0x7f   :  { %892 = vmatpush1.bf16.msra.mxu1 %v2995_v60 }
  0x80   :  { %893 = vmatprep.subr.bf16.mxu1 %v3000_v62 }
  0x83   :  { %894 = vmatpush1.bf16.msra.mxu1 %v2998_v61 }
  0x84   :  { %1076 = vmatprep.subr.bf16.mxu1 %v3004_v63 }
 0x119   :  { %v260_v3 = vpop.f32.mrb[0].mxu1 }
 0x11a   :  { %v262_v4 = vpop.f32.mrb[1].mxu1 }
 0x11b   :  { %v264_v6 = vpop.f32.mrb[2].mxu1 }
 0x11c   :  { %v266_v9 = vpop.f32.mrb[3].mxu1 }
 0x120   :  { %v414_v11 = vpop.f32.mrb[0].mxu0 }
 0x121   :  { %v2885_v13 = vadd.f32 %v414_v11, %v260_v3  ;;  %v416_v14 = vpop.f32.mrb[1].mxu0  ;;  %v270_v17 = vpop.f32.mrb[4].mxu1 }
 0x122   :  { %v2886_v15 = vadd.f32 %v416_v14, %v262_v4  ;;  %v418_v16 = vpop.f32.mrb[2].mxu0  ;;  %v272_v21 = vpop.f32.mrb[5].mxu1  ;;  %v541_v14 = vld [vmem:[#allocation3 + $0x18] sm:$0xff] }
 0x123   :  { %v452_v18 = vadd.f32 %v2885_v13, %v445_v10  ;;  %v2887_v19 = vadd.f32 %v418_v16, %v264_v6  ;;  %v420_v20 = vpop.f32.mrb[3].mxu0  ;;  %v274_v25 = vpop.f32.mrb[6].mxu1 }
 0x124   :  { %v453_v22 = vadd.f32 %v2886_v15, %v449_v12  ;;  %v2888_v24 = vadd.f32 %v420_v20, %v266_v9  ;;  %v276_v28 = vpop.f32.mrb[7].mxu1 }
 0x125   :  { %v460_v26 = vmax.f32 %v452_v18, 0.0  ;;  %v454_v27 = vadd.f32 %v2887_v19, %v445_v10 }
 0x126   :  { %v461_v29 = vmax.f32 %v453_v22, 0.0  ;;  %v455_v30 = vadd.f32 %v2888_v24, %v449_v12  ;;  %v545_v22 = vld [vmem:[#allocation3 + $0x28] sm:$0x11] }
 0x127   :  { %v462_v31 = vmax.f32 %v454_v27, 0.0 }
 0x128   :  { %v2810_v32 = vpack.c.bf16 %v461_v29, %v460_v26  ;;  %v463_v33 = vmax.f32 %v455_v30, 0.0  ;;  %v424_v34 = vpop.f32.mrb[4].mxu0 }
 0x129   :  { %v2889_v0 = vadd.f32 %v424_v34, %v270_v17  ;;  %v426_v36 = vpop.f32.mrb[5].mxu0 }
 0x12a   :  { %v479_v37 = vshrl.u32 %v2810_v32, 16  ;;  %v2811_v38 = vpack.c.bf16 %v463_v33, %v462_v31  ;;  %v2890_v39 = vadd.f32 %v426_v36, %v272_v21  ;;  %v428_v40 = vpop.f32.mrb[6].mxu0  ;;  %v482_v46 = vshll.u32 %v2810_v32, 16 }
 0x12b   :  { %v456_v41 = vadd.f32 %v2889_v0, %v445_v10  ;;  %v2891_v42 = vadd.f32 %v428_v40, %v274_v25  ;;  %v430_v44 = vpop.f32.mrb[7].mxu0 }
 0x12c   :  { %v481_v45 = vrot.slane %v479_v37, 7  ;;  %v487_v47 = vshrl.u32 %v2811_v38, 16  ;;  %v457_v48 = vadd.f32 %v2890_v39, %v449_v12  ;;  %v2892_v53 = vadd.f32 %v430_v44, %v276_v28 }
 0x12d   :  { %v464_v51 = vmax.f32 %v456_v41, 0.0  ;;  %v458_v52 = vadd.f32 %v2891_v42, %v445_v10  ;;  %v490_v56 = vshll.u32 %v2811_v38, 16 }
 0x12e   :  { %v484_v54 = vor.u32 %v482_v46, %v481_v45  ;;  %v489_v55 = vrot.slane %v487_v47, 7  ;;  %v465_v57 = vmax.f32 %v457_v48, 0.0  ;;  %v485_v58 = vrot.slane %v481_v45, 4 }
 0x12f   :  { %v466_v60 = vmax.f32 %v458_v52, 0.0  ;;  %v459_v61 = vadd.f32 %v2892_v53, %v449_v12 }
 0x130   :  { %v3516_v62 = vsel %vm3510_vm3, %v484_v54, %v503_v50  ;;  %v492_v63 = vor.u32 %v490_v56, %v489_v55  ;;  %v494_v1 = vrot.slane %v489_v55, 4  ;;  %v2812_v2 = vpack.c.bf16 %v465_v57, %v464_v51  ;;  %v3002_v56 = vld [vmem:[#allocation4] ss:$8 sps:$4 sm:$0xff]  }
 0x131   :  { %505 = vst [vmem:[#allocation3] sm:$0xff] %v3516_v62  ;;  %v467_v3 = vmax.f32 %v459_v61, 0.0 }
 0x132   :  { %v493_v4 = vsel %vm3430_vm7, %v485_v58, %v492_v63  ;;  %v508_v6 = vsel %vm3481_vm4, %v494_v1, %v507_v59  ;;  %v521_v7 = vshrl.u32 %v2812_v2, 16  ;;  %v524_v13 = vshll.u32 %v2812_v2, 16 }
 0x133   :  { %509 = vst [vmem:[#allocation3 + $0x10] sm:$0x11] %v508_v6  ;;  %v2813_v9 = vpack.c.bf16 %v467_v3, %v466_v60  ;;  %v3524_v10 = vcombine.high %v3516_v62, %v493_v4  ;;  %v3527_v11 = vcombine.low %v3516_v62, %v493_v4  ;;  %v3008_v60 = vld [vmem:[#allocation4 + $0x14] ss:$8 sps:$4 sm:$0xff]  }
 0x134   :  { %v523_v12 = vrot.slane %v521_v7, 7 }
 0x135   :  { %v529_v15 = vshrl.u32 %v2813_v9, 16  ;;  %v628_v17 = vshll.u32 %v3524_v10, 16  ;;  %v616_v18 = vshll.u32 %v3527_v11, 16  ;;  %v532_v20 = vshll.u32 %v2813_v9, 16 }
 0x136   :  { %v526_v16 = vor.u32 %v524_v13, %v523_v12  ;;  %v626_v24 = vshrl.u32 %v3524_v10, 16  ;;  %v527_v26 = vrot.slane %v523_v12, 4  ;;  %v614_v32 = vshrl.u32 %v3527_v11, 16  ;;  %v3012_v12 = vld [vmem:[#allocation4 + $0x24] ss:$8 sps:$4 sm:$0xff]  }
 0x137   :  { %v531_v19 = vrot.slane %v529_v15, 7  ;;  %v630_v31 = vrot.slane %v628_v17, 1  ;;  %v618_v33 = vrot.slane %v616_v18, 1 }
 0x138   :  { %v3533_v21 = vsel %vm3510_vm3, %v526_v16, %v541_v14  ;;  %v1129_v25 = vld [vmem:[#allocation3] sm:$0xee] }
 0x139   :  { %543 = vst [vmem:[#allocation3 + $0x18] sm:$0xff] %v3533_v21  ;;  %v534_v27 = vor.u32 %v532_v20, %v531_v19  ;;  %v536_v28 = vrot.slane %v531_v19, 4  ;;  %v2661_v29 = vcombine.high %v1129_v25, %v493_v4  ;;  %v2660_v34 = vcombine.low %v1129_v25, %v493_v4  ;;  %v3006_v4 = vld [vmem:[#allocation4 + $0x10] ss:$8 sps:$4 sm:$0xff]  }
 0x13a   :  { %v606_v30 = vld [vmem:[#allocation3 + $0x10] sm:$0x11]  ;;  %v631_v47 = vor.u32 %v630_v31, %v626_v24  ;;  %v619_v48 = vor.u32 %v618_v33, %v614_v32  ;;  %v3016_v31 = vld [vmem:[#allocation4 + $0x34] ss:$8 sps:$4 sm:$0xff]  }
 0x13b   :  { %v535_v35 = vsel %vm3430_vm7, %v527_v26, %v534_v27  ;;  %v546_v0 = vsel %vm3481_vm4, %v536_v28, %v545_v22  ;;  %v2593_v36 = vcombine.high %v606_v30, %v606_v30  ;;  %v2592_v37 = vcombine.low %v606_v30, %v606_v30  ;;  %v3010_v28 = vld [vmem:[#allocation4 + $0x20] ss:$8 sps:$4 sm:$0xff]   ;;  %v3103_v33 = vld [vmem:[#allocation4 + $0x404] ss:$8 sps:$4 sm:$0xff]  }
 0x13c   :  { %547 = vst [vmem:[#allocation3 + $0x28] sm:$0x11] %v546_v0  ;;  %v3543_v38 = vcombine.high %v3533_v21, %v535_v35  ;;  %v3546_v39 = vcombine.low %v3533_v21, %v535_v35  ;;  %v1139_v40 = vrot.slane %v2661_v29, 1  ;;  %v1136_v41 = vrot.slane %v2660_v34, 1  ;;  %v3101_v32 = vld [vmem:[#allocation4 + $0x400] ss:$8 sps:$4 sm:$0xff]   ;;  %1827 = vmatprep.subr.bf16.mxu0 %v3103_v33 }
 0x13d   :  { %v633_v42 = vshll.u32 %v2593_v36, 16  ;;  %v621_v44 = vshll.u32 %v2592_v37, 16  ;;  %v1140_v45 = vrot.slane %v2593_v36, 1  ;;  %v1137_v46 = vrot.slane %v2592_v37, 1  ;;  %v3014_v34 = vld [vmem:[#allocation4 + $0x30] ss:$8 sps:$4 sm:$0xff]   ;;  %1828 = vmatpush1.bf16.msra.mxu0 %v3101_v32 }
 0x13e   :  { %v659_v50 = vshll.u32 %v3543_v38, 16  ;;  %v647_v51 = vshll.u32 %v3546_v39, 16  ;;  %v657_v9 = vshrl.u32 %v3543_v38, 16  ;;  %v645_v13 = vshrl.u32 %v3546_v39, 16  ;;  %v3019_v0 = vld [vmem:[#allocation4 + $0x44] ss:$8 sps:$4 sm:$0xff]  }
 0x13f   :  { %v635_v52 = vrot.slane %v633_v42, 1  ;;  %v623_v53 = vrot.slane %v621_v44, 1  ;;  %v3551_v54 = vsel %vm351_vm11, %v1139_v40, %v1140_v45  ;;  %v3554_v55 = vsel %vm351_vm11, %v1136_v41, %v1137_v46  ;;  %v3104_v36 = vld [vmem:[#allocation4 + $0x410] ss:$8 sps:$4 sm:$0xff]   ;;  %v3109_v37 = vld [vmem:[#allocation4 + $0x424] ss:$8 sps:$4 sm:$0xff]  }
 0x140   :  { %v1130_v57 = vld [vmem:[#allocation3 + $0x18] sm:$0xee]  ;;  %v661_v2 = vrot.slane %v659_v50, 1  ;;  %v649_v3 = vrot.slane %v647_v51, 1  ;;  %v3022_v41 = vld [vmem:[#allocation4 + $0x54] ss:$8 sps:$4 sm:$0xff]  }
 0x141   :  { %v636_v58 = vsel %vm178_vm10, %v631_v47, %v635_v52  ;;  %v624_v59 = vsel %vm178_vm10, %v619_v48, %v623_v53  ;;  %v2663_v61 = vcombine.high %v1130_v57, %v535_v35  ;;  %v2662_v63 = vcombine.low %v1130_v57, %v535_v35  ;;  %v3106_v35 = vld [vmem:[#allocation4 + $0x414] ss:$8 sps:$4 sm:$0xff]   ;;  %v3017_v40 = vld [vmem:[#allocation4 + $0x40] ss:$8 sps:$4 sm:$0xff]   ;;  %v3020_v45 = vld [vmem:[#allocation4 + $0x50] ss:$8 sps:$4 sm:$0xff]  }
 0x142   :  { %895 = vmatprep.mubr.bf16.mxu1 %v636_v58  ;;  %v662_v20 = vor.u32 %v661_v2, %v657_v9  ;;  %v650_v22 = vor.u32 %v649_v3, %v645_v13  ;;  %1829 = vmatprep.subr.bf16.mxu0 %v3106_v35  ;;  %v3107_v42 = vld [vmem:[#allocation4 + $0x420] ss:$8 sps:$4 sm:$0xff]   ;;  %v3112_v44 = vld [vmem:[#allocation4 + $0x434] ss:$8 sps:$4 sm:$0xff]   ;;  %v3110_v46 = vld [vmem:[#allocation4 + $0x430] ss:$8 sps:$4 sm:$0xff]  }
 0x143   :  { %896 = vmatmul.mubr.bf16.vlgmr.msra.gmra.mrb[8].mxu1 %v624_v59  ;;  %v607_v1 = vld [vmem:[#allocation3 + $0x28] sm:$0x11]  ;;  %v1152_v14 = vrot.slane %v2663_v61, 1  ;;  %v1149_v15 = vrot.slane %v2662_v63, 1  ;;  %1830 = vmatpush1.bf16.msra.mxu0 %v3104_v36  ;;  %v3115_v47 = vld [vmem:[#allocation4 + $0x444] ss:$8 sps:$4 sm:$0xff]  }
 0x144   :  { %1077 = vmatpush1.bf16.msra.mxu1 %v3002_v56  ;;  %v2595_v6 = vcombine.high %v607_v1, %v607_v1  ;;  %v2594_v7 = vcombine.low %v607_v1, %v607_v1  ;;  %1831 = vmatprep.subr.bf16.mxu0 %v3109_v37  ;;  %v3023_v48 = vld [vmem:[#allocation4 + $0x60] ss:$8 sps:$4 sm:$0xff]   ;;  %v3028_v50 = vld [vmem:[#allocation4 + $0x74] ss:$8 sps:$4 sm:$0xff]   ;;  %v3026_v53 = vld [vmem:[#allocation4 + $0x70] ss:$8 sps:$4 sm:$0xff]  }
 0x145   :  { %1078 = vmatprep.subr.bf16.mxu1 %v3008_v60  ;;  %v3113_v51 = vld [vmem:[#allocation4 + $0x440] ss:$8 sps:$4 sm:$0xff]   ;;  %v3118_v52 = vld [vmem:[#allocation4 + $0x454] ss:$8 sps:$4 sm:$0xff]   ;;  %v3031_v56 = vld [vmem:[#allocation4 + $0x84] ss:$8 sps:$4 sm:$0xff]  }
 0x146   :  { %v664_v16 = vshll.u32 %v2595_v6, 16  ;;  %v652_v17 = vshll.u32 %v2594_v7, 16  ;;  %v1153_v18 = vrot.slane %v2595_v6, 1  ;;  %v1150_v19 = vrot.slane %v2594_v7, 1  ;;  %v3116_v57 = vld [vmem:[#allocation4 + $0x450] ss:$8 sps:$4 sm:$0xff]  }
 0x147   :  { %1832 = vmatpush1.bf16.msra.mxu0 %v3107_v42  ;;  %v3121_v58 = vld [vmem:[#allocation4 + $0x464] ss:$8 sps:$4 sm:$0xff]   ;;  %v3029_v59 = vld [vmem:[#allocation4 + $0x80] ss:$8 sps:$4 sm:$0xff]   ;;  %v3034_v60 = vld [vmem:[#allocation4 + $0x94] ss:$8 sps:$4 sm:$0xff]  }
 0x148   :  { %1079 = vmatpush1.bf16.msra.mxu1 %v3006_v4  ;;  %v666_v24 = vrot.slane %v664_v16, 1  ;;  %v654_v25 = vrot.slane %v652_v17, 1  ;;  %v3561_v26 = vsel %vm351_vm11, %v1152_v14, %v1153_v18  ;;  %v3564_v27 = vsel %vm351_vm11, %v1149_v15, %v1150_v19  ;;  %1833 = vmatprep.subr.bf16.mxu0 %v3112_v44  ;;  %v3119_v61 = vld [vmem:[#allocation4 + $0x460] ss:$8 sps:$4 sm:$0xff]   ;;  %v3124_v63 = vld [vmem:[#allocation4 + $0x474] ss:$8 sps:$4 sm:$0xff]  }
 0x149   :  { %1080 = vmatprep.subr.bf16.mxu1 %v3012_v12  ;;  %v3032_v1 = vld [vmem:[#allocation4 + $0x90] ss:$8 sps:$4 sm:$0xff]   ;;  %v3037_v2 = vld [vmem:[#allocation4 + $0xa4] ss:$8 sps:$4 sm:$0xff]   ;;  %v3035_v4 = vld [vmem:[#allocation4 + $0xa0] ss:$8 sps:$4 sm:$0xff]  }
 0x14a   :  { %v667_v29 = vsel %vm178_vm10, %v662_v20, %v666_v24  ;;  %v655_v30 = vsel %vm178_vm10, %v650_v22, %v654_v25  ;;  %v3122_v3 = vld [vmem:[#allocation4 + $0x470] ss:$8 sps:$4 sm:$0xff]   ;;  %v3040_v6 = vld [vmem:[#allocation4 + $0xb4] ss:$8 sps:$4 sm:$0xff]   ;;  %v3043_v9 = vld [vmem:[#allocation4 + $0xc4] ss:$8 sps:$4 sm:$0xff]  }
 0x14b   :  { %905 = vmatprep.mubr.bf16.mxu1 %v667_v29  ;;  %1834 = vmatpush1.bf16.msra.mxu0 %v3110_v46  ;;  %v3038_v7 = vld [vmem:[#allocation4 + $0xb0] ss:$8 sps:$4 sm:$0xff]   ;;  %v3041_v12 = vld [vmem:[#allocation4 + $0xc0] ss:$8 sps:$4 sm:$0xff]   ;;  %v3046_v13 = vld [vmem:[#allocation4 + $0xd4] ss:$8 sps:$4 sm:$0xff]  }
 0x14c   :  { %906 = vmatmul.mubr.bf16.gmra.mrb[12].mxu1 %v655_v30  ;;  %1835 = vmatprep.subr.bf16.mxu0 %v3115_v47  ;;  %v3044_v14 = vld [vmem:[#allocation4 + $0xd0] ss:$8 sps:$4 sm:$0xff]   ;;  %v3049_v15 = vld [vmem:[#allocation4 + $0xe4] ss:$8 sps:$4 sm:$0xff]   ;;  %v3047_v16 = vld [vmem:[#allocation4 + $0xe0] ss:$8 sps:$4 sm:$0xff]  }
 0x14d   :  { %1081 = vmatpush1.bf16.msra.mxu1 %v3010_v28  ;;  %1108 = vmatprep.mubr.bf16.mxu1 %v3524_v10  ;;  %v3025_v10 = vld [vmem:[#allocation4 + $0x64] ss:$8 sps:$4 sm:$0xff]   ;;  %v3052_v17 = vld [vmem:[#allocation4 + $0xf4] ss:$8 sps:$4 sm:$0xff]   ;;  %v3050_v18 = vld [vmem:[#allocation4 + $0xf0] ss:$8 sps:$4 sm:$0xff]  }
 0x14e   :  { %1082 = vmatprep.subr.bf16.mxu1 %v3016_v31  ;;  %v3055_v19 = vld [vmem:[#allocation4 + $0x204] ss:$8 sps:$4 sm:$0xff]   ;;  %v3053_v20 = vld [vmem:[#allocation4 + $0x200] ss:$8 sps:$4 sm:$0xff]   ;;  %v3058_v22 = vld [vmem:[#allocation4 + $0x214] ss:$8 sps:$4 sm:$0xff]  }
 0x14f   :  { %1836 = vmatpush1.bf16.msra.mxu0 %v3113_v51  ;;  %v3056_v24 = vld [vmem:[#allocation4 + $0x210] ss:$8 sps:$4 sm:$0xff]   ;;  %v3061_v25 = vld [vmem:[#allocation4 + $0x224] ss:$8 sps:$4 sm:$0xff]   ;;  %v3059_v28 = vld [vmem:[#allocation4 + $0x220] ss:$8 sps:$4 sm:$0xff]  }
 0x150   :  { %1837 = vmatprep.subr.bf16.mxu0 %v3118_v52  ;;  %v3064_v29 = vld [vmem:[#allocation4 + $0x234] ss:$8 sps:$4 sm:$0xff]   ;;  %v3062_v30 = vld [vmem:[#allocation4 + $0x230] ss:$8 sps:$4 sm:$0xff]   ;;  %v3067_v31 = vld [vmem:[#allocation4 + $0x244] ss:$8 sps:$4 sm:$0xff]  }
 0x151   :  { %1083 = vmatpush1.bf16.msra.mxu1 %v3014_v34  ;;  %v3068_v32 = vld [vmem:[#allocation4 + $0x250] ss:$8 sps:$4 sm:$0xff]   ;;  %v3073_v33 = vld [vmem:[#allocation4 + $0x264] ss:$8 sps:$4 sm:$0xff]   ;;  %v3071_v34 = vld [vmem:[#allocation4 + $0x260] ss:$8 sps:$4 sm:$0xff]  }
 0x152   :  { %1084 = vmatprep.subr.bf16.mxu1 %v3019_v0  ;;  %v3076_v35 = vld [vmem:[#allocation4 + $0x274] ss:$8 sps:$4 sm:$0xff]   ;;  %v3079_v0 = vld [vmem:[#allocation4 + $0x284] ss:$8 sps:$4 sm:$0xff]   ;;  %v3080_v37 = vld [vmem:[#allocation4 + $0x290] ss:$8 sps:$4 sm:$0xff]  }
 0x153   :  { %1838 = vmatpush1.bf16.msra.mxu0 %v3116_v57  ;;  %v3082_v36 = vld [vmem:[#allocation4 + $0x294] ss:$8 sps:$4 sm:$0xff]   ;;  %v3086_v44 = vld [vmem:[#allocation4 + $0x2b0] ss:$8 sps:$4 sm:$0xff]  }
 0x154   :  { %1839 = vmatprep.subr.bf16.mxu0 %v3121_v58  ;;  %v3088_v42 = vld [vmem:[#allocation4 + $0x2b4] ss:$8 sps:$4 sm:$0xff]   ;;  %v3092_v47 = vld [vmem:[#allocation4 + $0x2d0] ss:$8 sps:$4 sm:$0xff]  }
 0x155   :  { %1085 = vmatpush1.bf16.msra.mxu1 %v3017_v40  ;;  %v3085_v40 = vld [vmem:[#allocation4 + $0x2a4] ss:$8 sps:$4 sm:$0xff]   ;;  %v3094_v46 = vld [vmem:[#allocation4 + $0x2d4] ss:$8 sps:$4 sm:$0xff]   ;;  %v3098_v52 = vld [vmem:[#allocation4 + $0x2f0] ss:$8 sps:$4 sm:$0xff]  }
 0x156   :  { %1086 = vmatprep.subr.bf16.mxu1 %v3022_v41  ;;  %v3083_v41 = vld [vmem:[#allocation4 + $0x2a0] ss:$8 sps:$4 sm:$0xff]   ;;  %v3100_v51 = vld [vmem:[#allocation4 + $0x2f4] ss:$8 sps:$4 sm:$0xff]   ;;  %v3128_v58 = vld [vmem:[#allocation4 + $0x490] ss:$8 sps:$4 sm:$0xff]  }
 0x157   :  { %1840 = vmatpush1.bf16.msra.mxu0 %v3119_v61  ;;  %v3130_v57 = vld [vmem:[#allocation4 + $0x494] ss:$8 sps:$4 sm:$0xff]  }
 0x158   :  { %1841 = vmatprep.subr.bf16.mxu0 %v3124_v63  ;;  %v3136_v61 = vld [vmem:[#allocation4 + $0x4b4] ss:$8 sps:$4 sm:$0xff]   ;;  %v3134_v63 = vld [vmem:[#allocation4 + $0x4b0] ss:$8 sps:$4 sm:$0xff]  }
 0x159   :  { %1087 = vmatpush1.bf16.msra.mxu1 %v3020_v45  ;;  %v3091_v45 = vld [vmem:[#allocation4 + $0x2c4] ss:$8 sps:$4 sm:$0xff]  }
 0x15a   :  { %1088 = vmatprep.subr.bf16.mxu1 %v3025_v10  ;;  %v3089_v10 = vld [vmem:[#allocation4 + $0x2c0] ss:$8 sps:$4 sm:$0xff]  }
 0x15b   :  { %1842 = vmatpush1.bf16.msra.mxu0 %v3122_v3  ;;  %v3143_v3 = vld [vmem:[#allocation4 + $0x4e0] ss:$8 sps:$4 sm:$0xff]  }
 0x15d   :  { %1089 = vmatpush1.bf16.msra.mxu1 %v3023_v48  ;;  %v3097_v48 = vld [vmem:[#allocation4 + $0x2e4] ss:$8 sps:$4 sm:$0xff]  }
 0x15e   :  { %1090 = vmatprep.subr.bf16.mxu1 %v3028_v50  ;;  %v3095_v50 = vld [vmem:[#allocation4 + $0x2e0] ss:$8 sps:$4 sm:$0xff]  }
 0x161   :  { %1091 = vmatpush1.bf16.msra.mxu1 %v3026_v53  ;;  %v3127_v53 = vld [vmem:[#allocation4 + $0x484] ss:$8 sps:$4 sm:$0xff]  }
 0x162   :  { %1092 = vmatprep.subr.bf16.mxu1 %v3031_v56  ;;  %v3125_v56 = vld [vmem:[#allocation4 + $0x480] ss:$8 sps:$4 sm:$0xff]   ;;  %1843 = vmatprep.subr.bf16.mxu0 %v3127_v53 }
 0x163   :  { %1844 = vmatpush1.bf16.msra.mxu0 %v3125_v56  ;;  %v1471_v53 = vld [vmem:[#allocation3 + $0x10] sm:$0x11] }
 0x164   :  { %1845 = vmatprep.subr.bf16.mxu0 %v3130_v57 }
 0x165   :  { %1093 = vmatpush1.bf16.msra.mxu1 %v3029_v59  ;;  %v3133_v59 = vld [vmem:[#allocation4 + $0x4a4] ss:$8 sps:$4 sm:$0xff]  }
 0x166   :  { %1094 = vmatprep.subr.bf16.mxu1 %v3034_v60  ;;  %v3131_v60 = vld [vmem:[#allocation4 + $0x4a0] ss:$8 sps:$4 sm:$0xff]  }
 0x167   :  { %1846 = vmatpush1.bf16.msra.mxu0 %v3128_v58 }
 0x168   :  { %1847 = vmatprep.subr.bf16.mxu0 %v3133_v59 }
 0x169   :  { %1095 = vmatpush1.bf16.msra.mxu1 %v3032_v1  ;;  %v3140_v1 = vld [vmem:[#allocation4 + $0x4d0] ss:$8 sps:$4 sm:$0xff]  }
 0x16a   :  { %1096 = vmatprep.subr.bf16.mxu1 %v3037_v2  ;;  %v3145_v2 = vld [vmem:[#allocation4 + $0x4e4] ss:$8 sps:$4 sm:$0xff]  }
 0x16b   :  { %1848 = vmatpush1.bf16.msra.mxu0 %v3131_v60 }
 0x16c   :  { %1849 = vmatprep.subr.bf16.mxu0 %v3136_v61 }
 0x16d   :  { %1097 = vmatpush1.bf16.msra.mxu1 %v3035_v4  ;;  %v3146_v4 = vld [vmem:[#allocation4 + $0x4f0] ss:$8 sps:$4 sm:$0xff]  }
 0x16e   :  { %1098 = vmatprep.subr.bf16.mxu1 %v3040_v6  ;;  %v3148_v6 = vld [vmem:[#allocation4 + $0x4f4] ss:$8 sps:$4 sm:$0xff]  }
 0x16f   :  { %1850 = vmatpush1.bf16.msra.mxu0 %v3134_v63 }
 0x171   :  { %1099 = vmatpush1.bf16.msra.mxu1 %v3038_v7  ;;  %v3153_v7 = vld [vmem:[#allocation4 + $0x304] ss:$8 sps:$4 sm:$0xff]  }
 0x172   :  { %1100 = vmatprep.subr.bf16.mxu1 %v3043_v9  ;;  %v2587_v9 = vld [vmem:[%s3660_s3 + $0x1] ss:$4 sm:$0x3] }
 0x175   :  { %1101 = vmatpush1.bf16.msra.mxu1 %v3041_v12  ;;  %v1415_v12 = vrot.slane %v2587_v9, %v3493_v5 }
 0x176   :  { %1102 = vmatprep.subr.bf16.mxu1 %v3046_v13  ;;  %v1419_v13 = vrot.slane %v2587_v9, %v3498_v8 }
 0x179   :  { %1103 = vmatpush1.bf16.msra.mxu1 %v3044_v14 }
 0x17a   :  { %1104 = vmatprep.subr.bf16.mxu1 %v3049_v15 }
 0x17d   :  { %1105 = vmatpush1.bf16.msra.mxu1 %v3047_v16 }
 0x17e   :  { %1106 = vmatprep.subr.bf16.mxu1 %v3052_v17 }
 0x181   :  { %1107 = vmatpush1.bf16.msra.mxu1 %v3050_v18 }
 0x182   :  { %1350 = vmatprep.subr.bf16.mxu1 %v3055_v19 }
 0x184   :  { %1109 = vmatmul.mubr.bf16.vlgmr.msra.gmra.mrb[8].mxu1 %v3527_v11  ;;  %v3065_v11 = vld [vmem:[#allocation4 + $0x240] ss:$8 sps:$4 sm:$0xff]  }
 0x185   :  { %1118 = vmatprep.mubr.bf16.mxu1 %v3543_v38  ;;  %1351 = vmatpush1.bf16.msra.mxu1 %v3053_v20  ;;  %v3070_v38 = vld [vmem:[#allocation4 + $0x254] ss:$8 sps:$4 sm:$0xff]  }
 0x186   :  { %1352 = vmatprep.subr.bf16.mxu1 %v3058_v22 }
 0x189   :  { %1353 = vmatpush1.bf16.msra.mxu1 %v3056_v24 }
 0x18a   :  { %1354 = vmatprep.subr.bf16.mxu1 %v3061_v25 }
 0x18c   :  { %1119 = vmatmul.mubr.bf16.gmra.mrb[12].mxu1 %v3546_v39  ;;  %v3074_v39 = vld [vmem:[#allocation4 + $0x270] ss:$8 sps:$4 sm:$0xff]  }
 0x18d   :  { %1355 = vmatpush1.bf16.msra.mxu1 %v3059_v28  ;;  %1382 = vmatprep.mubr.bf16.mxu1 %v3551_v54  ;;  %v3077_v54 = vld [vmem:[#allocation4 + $0x280] ss:$8 sps:$4 sm:$0xff]  }
 0x18e   :  { %1356 = vmatprep.subr.bf16.mxu1 %v3064_v29 }
 0x191   :  { %1357 = vmatpush1.bf16.msra.mxu1 %v3062_v30 }
 0x192   :  { %1358 = vmatprep.subr.bf16.mxu1 %v3067_v31 }
 0x195   :  { %1359 = vmatpush1.bf16.msra.mxu1 %v3065_v11 }
 0x196   :  { %1360 = vmatprep.subr.bf16.mxu1 %v3070_v38 }
 0x199   :  { %1361 = vmatpush1.bf16.msra.mxu1 %v3068_v32 }
 0x19a   :  { %1362 = vmatprep.subr.bf16.mxu1 %v3073_v33 }
 0x19d   :  { %1363 = vmatpush1.bf16.msra.mxu1 %v3071_v34 }
 0x19e   :  { %1364 = vmatprep.subr.bf16.mxu1 %v3076_v35 }
 0x1a1   :  { %1365 = vmatpush1.bf16.msra.mxu1 %v3074_v39 }
 0x1a2   :  { %1366 = vmatprep.subr.bf16.mxu1 %v3079_v0 }
 0x1a5   :  { %1367 = vmatpush1.bf16.msra.mxu1 %v3077_v54 }
 0x1a6   :  { %1368 = vmatprep.subr.bf16.mxu1 %v3082_v36 }
 0x1a9   :  { %1369 = vmatpush1.bf16.msra.mxu1 %v3080_v37 }
 0x1aa   :  { %1370 = vmatprep.subr.bf16.mxu1 %v3085_v40 }
 0x1ad   :  { %1371 = vmatpush1.bf16.msra.mxu1 %v3083_v41 }
 0x1ae   :  { %1372 = vmatprep.subr.bf16.mxu1 %v3088_v42 }
 0x1b1   :  { %1373 = vmatpush1.bf16.msra.mxu1 %v3086_v44 }
 0x1b2   :  { %1374 = vmatprep.subr.bf16.mxu1 %v3091_v45 }
 0x1b5   :  { %1375 = vmatpush1.bf16.msra.mxu1 %v3089_v10 }
 0x1b6   :  { %1376 = vmatprep.subr.bf16.mxu1 %v3094_v46 }
 0x1b9   :  { %1377 = vmatpush1.bf16.msra.mxu1 %v3092_v47 }
 0x1ba   :  { %1378 = vmatprep.subr.bf16.mxu1 %v3097_v48 }
 0x1bd   :  { %1379 = vmatpush1.bf16.msra.mxu1 %v3095_v50 }
 0x1be   :  { %1380 = vmatprep.subr.bf16.mxu1 %v3100_v51 }
 0x1c1   :  { %1381 = vmatpush1.bf16.msra.mxu1 %v3098_v52 }
 0x1c4   :  { %1383 = vmatmul.mubr.bf16.vlgmr.msra.gmra.mrb[8].mxu1 %v3554_v55  ;;  %v3139_v55 = vld [vmem:[#allocation4 + $0x4c4] ss:$8 sps:$4 sm:$0xff]  }
 0x1c5   :  { %1392 = vmatprep.mubr.bf16.mxu1 %v3561_v26  ;;  %v3137_v26 = vld [vmem:[#allocation4 + $0x4c0] ss:$8 sps:$4 sm:$0xff]   ;;  %1851 = vmatprep.subr.bf16.mxu0 %v3139_v55 }
 0x1c6   :  { %1852 = vmatpush1.bf16.msra.mxu0 %v3137_v26 }
 0x1cc   :  { %1393 = vmatmul.mubr.bf16.gmra.mrb[12].mxu1 %v3564_v27  ;;  %v3142_v27 = vld [vmem:[#allocation4 + $0x4d4] ss:$8 sps:$4 sm:$0xff]  }
 0x1cd   :  { %1853 = vmatprep.subr.bf16.mxu0 %v3142_v27 }
 0x1ce   :  { %1854 = vmatpush1.bf16.msra.mxu0 %v3140_v1 }
 0x1cf   :  { %1855 = vmatprep.subr.bf16.mxu0 %v3145_v2 }
 0x1d2   :  { %1856 = vmatpush1.bf16.msra.mxu0 %v3143_v3 }
 0x1d3   :  { %1857 = vmatprep.subr.bf16.mxu0 %v3148_v6 }
 0x1d6   :  { %1858 = vmatpush1.bf16.msra.mxu0 %v3146_v4 }
 0x1d7   :  { %2040 = vmatprep.subr.bf16.mxu0 %v3153_v7 }
 0x297   :  { %v1384_v14 = vpop.f32.mrb[8].mxu1 }
 0x298   :  { %v1422_v15 = vadd.f32 %v1415_v12, %v1384_v14  ;;  %v1386_v16 = vpop.f32.mrb[9].mxu1 }
 0x299   :  { %v1423_v17 = vadd.f32 %v1419_v13, %v1386_v16  ;;  %v1388_v18 = vpop.f32.mrb[10].mxu1 }
 0x29a   :  { %v1430_v19 = vmax.f32 %v1422_v15, 0.0  ;;  %v1424_v20 = vadd.f32 %v1415_v12, %v1388_v18  ;;  %v1390_v22 = vpop.f32.mrb[11].mxu1  ;;  %v1508_v15 = vld [vmem:[#allocation3 + $0x28] sm:$0x11] }
 0x29b   :  { %v1431_v24 = vmax.f32 %v1423_v17, 0.0  ;;  %v1425_v25 = vadd.f32 %v1419_v13, %v1390_v22 }
 0x29c   :  { %v1432_v28 = vmax.f32 %v1424_v20, 0.0 }
 0x29d   :  { %v2814_v29 = vpack.c.bf16 %v1431_v24, %v1430_v19  ;;  %v1433_v30 = vmax.f32 %v1425_v25, 0.0 }
 0x29f   :  { %v1449_v31 = vshrl.u32 %v2814_v29, 16  ;;  %v2815_v11 = vpack.c.bf16 %v1433_v30, %v1432_v28  ;;  %v1394_v38 = vpop.f32.mrb[12].mxu1  ;;  %v1452_v35 = vshll.u32 %v2814_v29, 16 }
 0x2a0   :  { %v1426_v32 = vadd.f32 %v1415_v12, %v1394_v38  ;;  %v1396_v33 = vpop.f32.mrb[13].mxu1 }
 0x2a1   :  { %v1451_v34 = vrot.slane %v1449_v31, 7  ;;  %v1457_v39 = vshrl.u32 %v2815_v11, 16  ;;  %v1427_v0 = vadd.f32 %v1419_v13, %v1396_v33  ;;  %v1398_v54 = vpop.f32.mrb[14].mxu1  ;;  %v1460_v44 = vshll.u32 %v2815_v11, 16 }
 0x2a2   :  { %v1434_v36 = vmax.f32 %v1426_v32, 0.0  ;;  %v1428_v37 = vadd.f32 %v1415_v12, %v1398_v54  ;;  %v1400_v40 = vpop.f32.mrb[15].mxu1 }
 0x2a3   :  { %v1454_v41 = vor.u32 %v1452_v35, %v1451_v34  ;;  %v1459_v42 = vrot.slane %v1457_v39, 7  ;;  %v1435_v45 = vmax.f32 %v1427_v0, 0.0  ;;  %v1455_v10 = vrot.slane %v1451_v34, 4 }
 0x2a4   :  { %v1436_v46 = vmax.f32 %v1428_v37, 0.0  ;;  %v1429_v47 = vadd.f32 %v1419_v13, %v1400_v40  ;;  %v3151_v37 = vld [vmem:[#allocation4 + $0x300] ss:$8 sps:$4 sm:$0xff]  }
 0x2a5   :  { %v1468_v48 = vsel %vm3510_vm3, %v1454_v41, %v3516_v62  ;;  %v1462_v50 = vor.u32 %v1460_v44, %v1459_v42  ;;  %v1464_v51 = vrot.slane %v1459_v42, 4  ;;  %v2816_v52 = vpack.c.bf16 %v1435_v45, %v1434_v36  ;;  %v3156_v44 = vld [vmem:[#allocation4 + $0x314] ss:$8 sps:$4 sm:$0xff]  }
 0x2a6   :  { %1469 = vst [vmem:[#allocation3] sm:$0xff] %v1468_v48  ;;  %v1437_v56 = vmax.f32 %v1429_v47, 0.0 }
 0x2a7   :  { %v1463_v57 = vsel %vm3430_vm7, %v1455_v10, %v1462_v50  ;;  %v1472_v58 = vsel %vm3481_vm4, %v1464_v51, %v1471_v53  ;;  %v1485_v59 = vshrl.u32 %v2816_v52, 16  ;;  %v1488_v55 = vshll.u32 %v2816_v52, 16  ;;  %v3154_v50 = vld [vmem:[#allocation4 + $0x310] ss:$8 sps:$4 sm:$0xff]  }
 0x2a8   :  { %1473 = vst [vmem:[#allocation3 + $0x10] sm:$0x11] %v1472_v58  ;;  %v2817_v60 = vpack.c.bf16 %v1437_v56, %v1436_v46  ;;  %v3588_v61 = vcombine.low %v1468_v48, %v1463_v57  ;;  %v3590_v63 = vcombine.high %v1468_v48, %v1463_v57  ;;  %v3160_v56 = vld [vmem:[#allocation4 + $0x324] ss:$8 sps:$4 sm:$0xff]  }
 0x2a9   :  { %v1487_v62 = vrot.slane %v1485_v59, 7 }
 0x2aa   :  { %v1493_v26 = vshrl.u32 %v2817_v60, 16  ;;  %v1592_v1 = vshll.u32 %v3590_v63, 16  ;;  %v1580_v2 = vshll.u32 %v3588_v61, 16  ;;  %v1496_v4 = vshll.u32 %v2817_v60, 16 }
 0x2ab   :  { %v1490_v27 = vor.u32 %v1488_v55, %v1487_v62  ;;  %v1590_v7 = vshrl.u32 %v3590_v63, 16  ;;  %v1491_v12 = vrot.slane %v1487_v62, 4  ;;  %v1578_v19 = vshrl.u32 %v3588_v61, 16 }
 0x2ac   :  { %v1495_v3 = vrot.slane %v1493_v26, 7  ;;  %v1594_v18 = vrot.slane %v1592_v1, 1  ;;  %v1582_v20 = vrot.slane %v1580_v2, 1 }
 0x2ad   :  { %v1505_v6 = vsel %vm3510_vm3, %v1490_v27, %v3533_v21  ;;  %v2093_v9 = vld [vmem:[#allocation3] sm:$0xee] }
 0x2ae   :  { %1506 = vst [vmem:[#allocation3 + $0x18] sm:$0xff] %v1505_v6  ;;  %v1498_v13 = vor.u32 %v1496_v4, %v1495_v3  ;;  %v1500_v14 = vrot.slane %v1495_v3, 4  ;;  %v2773_v16 = vcombine.low %v2093_v9, %v1463_v57  ;;  %v2774_v22 = vcombine.high %v2093_v9, %v1463_v57 }
 0x2af   :  { %v1570_v17 = vld [vmem:[#allocation3 + $0x10] sm:$0x11]  ;;  %v1595_v34 = vor.u32 %v1594_v18, %v1590_v7  ;;  %v1583_v35 = vor.u32 %v1582_v20, %v1578_v19  ;;  %v3168_v18 = vld [vmem:[#allocation4 + $0x350] ss:$8 sps:$4 sm:$0xff]  }
 0x2b0   :  { %v1499_v24 = vsel %vm3430_vm7, %v1491_v12, %v1498_v13  ;;  %v1509_v49 = vsel %vm3481_vm4, %v1500_v14, %v1508_v15  ;;  %v2705_v21 = vcombine.low %v1570_v17, %v1570_v17  ;;  %v2706_v25 = vcombine.high %v1570_v17, %v1570_v17  ;;  %v3158_v7 = vld [vmem:[#allocation4 + $0x320] ss:$8 sps:$4 sm:$0xff]   ;;  %v3164_v13 = vld [vmem:[#allocation4 + $0x334] ss:$8 sps:$4 sm:$0xff]   ;;  %v3162_v14 = vld [vmem:[#allocation4 + $0x330] ss:$8 sps:$4 sm:$0xff]  }
 0x2b1   :  { %1510 = vst [vmem:[#allocation3 + $0x28] sm:$0x11] %v1509_v49  ;;  %v3603_v28 = vcombine.high %v1505_v6, %v1499_v24  ;;  %v3605_v29 = vcombine.low %v1505_v6, %v1499_v24  ;;  %v2100_v30 = vrot.slane %v2773_v16, 1  ;;  %v2103_v31 = vrot.slane %v2774_v22, 1  ;;  %v3167_v15 = vld [vmem:[#allocation4 + $0x344] ss:$8 sps:$4 sm:$0xff]  }
 0x2b2   :  { %v1597_v11 = vshll.u32 %v2706_v25, 16  ;;  %v1585_v38 = vshll.u32 %v2705_v21, 16  ;;  %v2104_v32 = vrot.slane %v2706_v25, 1  ;;  %v2101_v33 = vrot.slane %v2705_v21, 1  ;;  %v3165_v16 = vld [vmem:[#allocation4 + $0x340] ss:$8 sps:$4 sm:$0xff]  }
 0x2b3   :  { %v1623_v23 = vshll.u32 %v3603_v28, 16  ;;  %v1611_v43 = vshll.u32 %v3605_v29, 16  ;;  %v1621_v53 = vshrl.u32 %v3603_v28, 16  ;;  %v1609_v57 = vshrl.u32 %v3605_v29, 16  ;;  %v3170_v17 = vld [vmem:[#allocation4 + $0x354] ss:$8 sps:$4 sm:$0xff]  }
 0x2b4   :  { %v1599_v39 = vrot.slane %v1597_v11, 1  ;;  %v1587_v0 = vrot.slane %v1585_v38, 1  ;;  %v3610_v54 = vsel %vm351_vm11, %v2103_v31, %v2104_v32  ;;  %v3613_v36 = vsel %vm351_vm11, %v2100_v30, %v2101_v33  ;;  %v3173_v19 = vld [vmem:[#allocation4 + $0x364] ss:$8 sps:$4 sm:$0xff]   ;;  %v3171_v20 = vld [vmem:[#allocation4 + $0x360] ss:$8 sps:$4 sm:$0xff]  }
 0x2b5   :  { %v2094_v40 = vld [vmem:[#allocation3 + $0x18] sm:$0xee]  ;;  %v1625_v47 = vrot.slane %v1623_v23, 1  ;;  %v1613_v48 = vrot.slane %v1611_v43, 1  ;;  %v3176_v22 = vld [vmem:[#allocation4 + $0x374] ss:$8 sps:$4 sm:$0xff]  }
 0x2b6   :  { %v1600_v41 = vsel %vm178_vm10, %v1595_v34, %v1599_v39  ;;  %v1588_v42 = vsel %vm178_vm10, %v1583_v35, %v1587_v0  ;;  %v2776_v45 = vcombine.high %v2094_v40, %v1499_v24  ;;  %v2775_v10 = vcombine.low %v2094_v40, %v1499_v24  ;;  %v3174_v24 = vld [vmem:[#allocation4 + $0x370] ss:$8 sps:$4 sm:$0xff]   ;;  %v3179_v49 = vld [vmem:[#allocation4 + $0x384] ss:$8 sps:$4 sm:$0xff]   ;;  %v3182_v21 = vld [vmem:[#allocation4 + $0x394] ss:$8 sps:$4 sm:$0xff]  }
 0x2b7   :  { %1859 = vmatprep.mubr.bf16.mxu0 %v1600_v41  ;;  %v1626_v27 = vor.u32 %v1625_v47, %v1621_v53  ;;  %v1614_v1 = vor.u32 %v1613_v48, %v1609_v57  ;;  %v3180_v25 = vld [vmem:[#allocation4 + $0x390] ss:$8 sps:$4 sm:$0xff]   ;;  %v3185_v30 = vld [vmem:[#allocation4 + $0x3a4] ss:$8 sps:$4 sm:$0xff]   ;;  %v3183_v31 = vld [vmem:[#allocation4 + $0x3a0] ss:$8 sps:$4 sm:$0xff]  }
 0x2b8   :  { %1860 = vmatmul.mubr.bf16.vlgmr.msra.gmra.mrb[8].mxu0 %v1588_v42  ;;  %v1571_v46 = vld [vmem:[#allocation3 + $0x28] sm:$0x11]  ;;  %v2116_v58 = vrot.slane %v2776_v45, 1  ;;  %v2113_v59 = vrot.slane %v2775_v10, 1  ;;  %v3191_v32 = vld [vmem:[#allocation4 + $0x3c4] ss:$8 sps:$4 sm:$0xff]  }
 0x2b9   :  { %2041 = vmatpush1.bf16.msra.mxu0 %v3151_v37  ;;  %v2708_v51 = vcombine.high %v1571_v46, %v1571_v46  ;;  %v2707_v52 = vcombine.low %v1571_v46, %v1571_v46  ;;  %v3188_v11 = vld [vmem:[#allocation4 + $0x3b4] ss:$8 sps:$4 sm:$0xff]   ;;  %v3186_v38 = vld [vmem:[#allocation4 + $0x3b0] ss:$8 sps:$4 sm:$0xff]   ;;  %v3189_v33 = vld [vmem:[#allocation4 + $0x3c0] ss:$8 sps:$4 sm:$0xff]  }
 0x2ba   :  { %2042 = vmatprep.subr.bf16.mxu0 %v3156_v44  ;;  %v3194_v34 = vld [vmem:[#allocation4 + $0x3d4] ss:$8 sps:$4 sm:$0xff]   ;;  %v3192_v35 = vld [vmem:[#allocation4 + $0x3d0] ss:$8 sps:$4 sm:$0xff]   ;;  %v3197_v23 = vld [vmem:[#allocation4 + $0x3e4] ss:$8 sps:$4 sm:$0xff]  }
 0x2bb   :  { %v1628_v60 = vshll.u32 %v2708_v51, 16  ;;  %v1616_v62 = vshll.u32 %v2707_v52, 16  ;;  %v2117_v55 = vrot.slane %v2708_v51, 1  ;;  %v2114_v26 = vrot.slane %v2707_v52, 1  ;;  %v3195_v43 = vld [vmem:[#allocation4 + $0x3e0] ss:$8 sps:$4 sm:$0xff]  }
 0x2bc   :  { %v3200_v39 = vld [vmem:[#allocation4 + $0x3f4] ss:$8 sps:$4 sm:$0xff]   ;;  %v3198_v0 = vld [vmem:[#allocation4 + $0x3f0] ss:$8 sps:$4 sm:$0xff]   ;;  %v3203_v37 = vld [vmem:[#allocation4 + $0x504] ss:$8 sps:$4 sm:$0xff]  }
 0x2bd   :  { %2043 = vmatpush1.bf16.msra.mxu0 %v3154_v50  ;;  %v1630_v2 = vrot.slane %v1628_v60, 1  ;;  %v1618_v3 = vrot.slane %v1616_v62, 1  ;;  %v3620_v4 = vsel %vm351_vm11, %v2116_v58, %v2117_v55  ;;  %v3623_v6 = vsel %vm351_vm11, %v2113_v59, %v2114_v26  ;;  %v3201_v40 = vld [vmem:[#allocation4 + $0x500] ss:$8 sps:$4 sm:$0xff]   ;;  %v3206_v41 = vld [vmem:[#allocation4 + $0x514] ss:$8 sps:$4 sm:$0xff]  }
 0x2be   :  { %2044 = vmatprep.subr.bf16.mxu0 %v3160_v56  ;;  %v3204_v42 = vld [vmem:[#allocation4 + $0x510] ss:$8 sps:$4 sm:$0xff]   ;;  %v3209_v44 = vld [vmem:[#allocation4 + $0x524] ss:$8 sps:$4 sm:$0xff]   ;;  %v3207_v45 = vld [vmem:[#allocation4 + $0x520] ss:$8 sps:$4 sm:$0xff]  }
 0x2bf   :  { %v1631_v9 = vsel %vm178_vm10, %v1626_v27, %v1630_v2  ;;  %v1619_v12 = vsel %vm178_vm10, %v1614_v1, %v1618_v3  ;;  %v3212_v10 = vld [vmem:[#allocation4 + $0x534] ss:$8 sps:$4 sm:$0xff]   ;;  %v3210_v46 = vld [vmem:[#allocation4 + $0x530] ss:$8 sps:$4 sm:$0xff]   ;;  %v3215_v47 = vld [vmem:[#allocation4 + $0x544] ss:$8 sps:$4 sm:$0xff]  }
 0x2c0   :  { %1869 = vmatprep.mubr.bf16.mxu0 %v1631_v9  ;;  %v3216_v48 = vld [vmem:[#allocation4 + $0x550] ss:$8 sps:$4 sm:$0xff]   ;;  %v3221_v50 = vld [vmem:[#allocation4 + $0x564] ss:$8 sps:$4 sm:$0xff]   ;;  %v3219_v51 = vld [vmem:[#allocation4 + $0x560] ss:$8 sps:$4 sm:$0xff]  }
 0x2c1   :  { %1870 = vmatmul.mubr.bf16.gmra.mrb[12].mxu0 %v1619_v12  ;;  %v3224_v52 = vld [vmem:[#allocation4 + $0x574] ss:$8 sps:$4 sm:$0xff]   ;;  %v3227_v53 = vld [vmem:[#allocation4 + $0x584] ss:$8 sps:$4 sm:$0xff]   ;;  %v3228_v57 = vld [vmem:[#allocation4 + $0x590] ss:$8 sps:$4 sm:$0xff]  }
 0x2c2   :  { %2045 = vmatpush1.bf16.msra.mxu0 %v3158_v7  ;;  %2072 = vmatprep.mubr.bf16.mxu0 %v3590_v63  ;;  %v3177_v63 = vld [vmem:[#allocation4 + $0x380] ss:$8 sps:$4 sm:$0xff]   ;;  %v3230_v56 = vld [vmem:[#allocation4 + $0x594] ss:$8 sps:$4 sm:$0xff]   ;;  %v3233_v58 = vld [vmem:[#allocation4 + $0x5a4] ss:$8 sps:$4 sm:$0xff]  }
 0x2c3   :  { %2046 = vmatprep.subr.bf16.mxu0 %v3164_v13  ;;  %v3231_v59 = vld [vmem:[#allocation4 + $0x5a0] ss:$8 sps:$4 sm:$0xff]   ;;  %v3236_v60 = vld [vmem:[#allocation4 + $0x5b4] ss:$8 sps:$4 sm:$0xff]   ;;  %v3234_v62 = vld [vmem:[#allocation4 + $0x5b0] ss:$8 sps:$4 sm:$0xff]  }
 0x2c4   :  { %v3239_v55 = vld [vmem:[#allocation4 + $0x5c4] ss:$8 sps:$4 sm:$0xff]   ;;  %v3237_v26 = vld [vmem:[#allocation4 + $0x5c0] ss:$8 sps:$4 sm:$0xff]   ;;  %v3242_v27 = vld [vmem:[#allocation4 + $0x5d4] ss:$8 sps:$4 sm:$0xff]  }
 0x2c5   :  { %v3240_v1 = vld [vmem:[#allocation4 + $0x5d0] ss:$8 sps:$4 sm:$0xff]   ;;  %v3245_v2 = vld [vmem:[#allocation4 + $0x5e4] ss:$8 sps:$4 sm:$0xff]   ;;  %v3243_v3 = vld [vmem:[#allocation4 + $0x5e0] ss:$8 sps:$4 sm:$0xff]  }
 0x2c6   :  { %2047 = vmatpush1.bf16.msra.mxu0 %v3162_v14  ;;  %v3248_v7 = vld [vmem:[#allocation4 + $0x5f4] ss:$8 sps:$4 sm:$0xff]   ;;  %v3246_v9 = vld [vmem:[#allocation4 + $0x5f0] ss:$8 sps:$4 sm:$0xff]   ;;  %v2449_v12 = vld [vmem:[#allocation7 + $0x80] sm:$0xff] }
 0x2c7   :  { %2048 = vmatprep.subr.bf16.mxu0 %v3167_v15  ;;  %v2450_v13 = vld [vmem:[#allocation7 + $0x88] sm:$0xff]  ;;  %v2433_v15 = vld [vmem:[#allocation7] sm:$0xff] }
 0x2c8   :  { %v2853_v14 = vpack.c.bf16 %v2450_v13, %v2449_v12 }
 0x2ca   :  { %2049 = vmatpush1.bf16.msra.mxu0 %v3165_v16  ;;  %v2434_v16 = vld [vmem:[#allocation7 + $0x8] sm:$0xff]  ;;  %2854 = vmatprep.subr.bf16.mxu1 %v2853_v14 }
 0x2cb   :  { %2050 = vmatprep.subr.bf16.mxu0 %v3170_v17  ;;  %v2855_v17 = vpack.c.bf16 %v2434_v16, %v2433_v15 }
 0x2cd   :  { %2856 = vmatpush3.bf16.msra.mxu1 %v2855_v17 }
 0x2ce   :  { %2051 = vmatpush1.bf16.msra.mxu0 %v3168_v18  ;;  %v2451_v18 = vld [vmem:[#allocation7 + $0x90] sm:$0xff] }
 0x2cf   :  { %2052 = vmatprep.subr.bf16.mxu0 %v3173_v19  ;;  %v2452_v19 = vld [vmem:[#allocation7 + $0x98] sm:$0xff] }
 0x2d2   :  { %2053 = vmatpush1.bf16.msra.mxu0 %v3171_v20  ;;  %v2857_v20 = vpack.c.bf16 %v2452_v19, %v2451_v18 }
 0x2d3   :  { %2054 = vmatprep.subr.bf16.mxu0 %v3176_v22  ;;  %v2435_v22 = vld [vmem:[#allocation7 + $0x10] sm:$0xff] }
 0x2d4   :  { %2858 = vmatprep.subr.bf16.mxu1 %v2857_v20 }
 0x2d6   :  { %2055 = vmatpush1.bf16.msra.mxu0 %v3174_v24  ;;  %v2436_v24 = vld [vmem:[#allocation7 + $0x18] sm:$0xff] }
 0x2d7   :  { %2056 = vmatprep.subr.bf16.mxu0 %v3179_v49  ;;  %v2859_v49 = vpack.c.bf16 %v2436_v24, %v2435_v22 }
 0x2d9   :  { %2860 = vmatpush3.bf16.msra.mxu1 %v2859_v49 }
 0x2da   :  { %2057 = vmatpush1.bf16.msra.mxu0 %v3177_v63 }
 0x2db   :  { %2058 = vmatprep.subr.bf16.mxu0 %v3182_v21  ;;  %v2438_v21 = vld [vmem:[#allocation7 + $0x28] sm:$0xff] }
 0x2de   :  { %2059 = vmatpush1.bf16.msra.mxu0 %v3180_v25 }
 0x2df   :  { %2060 = vmatprep.subr.bf16.mxu0 %v3185_v30  ;;  %v2455_v30 = vld [vmem:[#allocation7 + $0xb0] sm:$0xff] }
 0x2e2   :  { %2061 = vmatpush1.bf16.msra.mxu0 %v3183_v31  ;;  %v2456_v31 = vld [vmem:[#allocation7 + $0xb8] sm:$0xff] }
 0x2e3   :  { %2062 = vmatprep.subr.bf16.mxu0 %v3188_v11  ;;  %v2865_v11 = vpack.c.bf16 %v2456_v31, %v2455_v30 }
 0x2e6   :  { %2063 = vmatpush1.bf16.msra.mxu0 %v3186_v38  ;;  %v2439_v38 = vld [vmem:[#allocation7 + $0x30] sm:$0xff] }
 0x2e7   :  { %2064 = vmatprep.subr.bf16.mxu0 %v3191_v32  ;;  %v2440_v32 = vld [vmem:[#allocation7 + $0x38] sm:$0xff] }
 0x2ea   :  { %2065 = vmatpush1.bf16.msra.mxu0 %v3189_v33  ;;  %v2867_v33 = vpack.c.bf16 %v2440_v32, %v2439_v38 }
 0x2eb   :  { %2066 = vmatprep.subr.bf16.mxu0 %v3194_v34  ;;  %v2457_v34 = vld [vmem:[#allocation7 + $0xc0] sm:$0xff] }
 0x2ee   :  { %2067 = vmatpush1.bf16.msra.mxu0 %v3192_v35  ;;  %v2458_v35 = vld [vmem:[#allocation7 + $0xc8] sm:$0xff] }
 0x2ef   :  { %2068 = vmatprep.subr.bf16.mxu0 %v3197_v23  ;;  %v2869_v23 = vpack.c.bf16 %v2458_v35, %v2457_v34 }
 0x2f2   :  { %2069 = vmatpush1.bf16.msra.mxu0 %v3195_v43  ;;  %v2441_v43 = vld [vmem:[#allocation7 + $0x40] sm:$0xff] }
 0x2f3   :  { %2070 = vmatprep.subr.bf16.mxu0 %v3200_v39  ;;  %v2442_v39 = vld [vmem:[#allocation7 + $0x48] sm:$0xff] }
 0x2f6   :  { %2071 = vmatpush1.bf16.msra.mxu0 %v3198_v0  ;;  %v2871_v0 = vpack.c.bf16 %v2442_v39, %v2441_v43 }
 0x2f7   :  { %2314 = vmatprep.subr.bf16.mxu0 %v3203_v37  ;;  %v2459_v37 = vld [vmem:[#allocation7 + $0xd0] sm:$0xff] }
 0x2f9   :  { %2073 = vmatmul.mubr.bf16.vlgmr.msra.gmra.mrb[8].mxu0 %v3588_v61  ;;  %v3213_v61 = vld [vmem:[#allocation4 + $0x540] ss:$8 sps:$4 sm:$0xff]  }
 0x2fa   :  { %2082 = vmatprep.mubr.bf16.mxu0 %v3603_v28  ;;  %2315 = vmatpush1.bf16.msra.mxu0 %v3201_v40  ;;  %v3218_v28 = vld [vmem:[#allocation4 + $0x554] ss:$8 sps:$4 sm:$0xff]  }
 0x2fb   :  { %2316 = vmatprep.subr.bf16.mxu0 %v3206_v41  ;;  %v2460_v40 = vld [vmem:[#allocation7 + $0xd8] sm:$0xff] }
 0x2fc   :  { %v2873_v41 = vpack.c.bf16 %v2460_v40, %v2459_v37 }
 0x2fe   :  { %2317 = vmatpush1.bf16.msra.mxu0 %v3204_v42  ;;  %v2443_v42 = vld [vmem:[#allocation7 + $0x50] sm:$0xff] }
 0x2ff   :  { %2318 = vmatprep.subr.bf16.mxu0 %v3209_v44  ;;  %v2444_v44 = vld [vmem:[#allocation7 + $0x58] sm:$0xff] }
 0x301   :  { %2083 = vmatmul.mubr.bf16.gmra.mrb[12].mxu0 %v3605_v29  ;;  %v3222_v29 = vld [vmem:[#allocation4 + $0x570] ss:$8 sps:$4 sm:$0xff]  }
 0x302   :  { %2319 = vmatpush1.bf16.msra.mxu0 %v3207_v45  ;;  %2346 = vmatprep.mubr.bf16.mxu0 %v3610_v54  ;;  %v3225_v54 = vld [vmem:[#allocation4 + $0x580] ss:$8 sps:$4 sm:$0xff]   ;;  %v2875_v45 = vpack.c.bf16 %v2444_v44, %v2443_v42 }
 0x303   :  { %2320 = vmatprep.subr.bf16.mxu0 %v3212_v10  ;;  %v2461_v10 = vld [vmem:[#allocation7 + $0xe0] sm:$0xff] }
 0x306   :  { %2321 = vmatpush1.bf16.msra.mxu0 %v3210_v46  ;;  %v2462_v46 = vld [vmem:[#allocation7 + $0xe8] sm:$0xff] }
 0x307   :  { %2322 = vmatprep.subr.bf16.mxu0 %v3215_v47  ;;  %v2877_v47 = vpack.c.bf16 %v2462_v46, %v2461_v10 }
 0x30a   :  { %2323 = vmatpush1.bf16.msra.mxu0 %v3213_v61  ;;  %v2445_v61 = vld [vmem:[#allocation7 + $0x60] sm:$0xff] }
 0x30b   :  { %2324 = vmatprep.subr.bf16.mxu0 %v3218_v28  ;;  %v2446_v28 = vld [vmem:[#allocation7 + $0x68] sm:$0xff] }
 0x30e   :  { %2325 = vmatpush1.bf16.msra.mxu0 %v3216_v48  ;;  %v2879_v48 = vpack.c.bf16 %v2446_v28, %v2445_v61 }
 0x30f   :  { %2326 = vmatprep.subr.bf16.mxu0 %v3221_v50  ;;  %v2463_v50 = vld [vmem:[#allocation7 + $0xf0] sm:$0xff] }
 0x312   :  { %2327 = vmatpush1.bf16.msra.mxu0 %v3219_v51  ;;  %v2464_v51 = vld [vmem:[#allocation7 + $0xf8] sm:$0xff] }
 0x313   :  { %2328 = vmatprep.subr.bf16.mxu0 %v3224_v52  ;;  %v2881_v52 = vpack.c.bf16 %v2464_v51, %v2463_v50 }
 0x316   :  { %2329 = vmatpush1.bf16.msra.mxu0 %v3222_v29  ;;  %v2447_v29 = vld [vmem:[#allocation7 + $0x70] sm:$0xff] }
 0x317   :  { %2330 = vmatprep.subr.bf16.mxu0 %v3227_v53  ;;  %v2448_v53 = vld [vmem:[#allocation7 + $0x78] sm:$0xff] }
 0x31a   :  { %2331 = vmatpush1.bf16.msra.mxu0 %v3225_v54  ;;  %v2883_v54 = vpack.c.bf16 %v2448_v53, %v2447_v29 }
 0x31b   :  { %2332 = vmatprep.subr.bf16.mxu0 %v3230_v56  ;;  %v2700_v56 = vld [vmem:[%s3660_s3 + $0x2] ss:$4 sm:$0x3] }
 0x31e   :  { %2333 = vmatpush1.bf16.msra.mxu0 %v3228_v57  ;;  %v2379_v57 = vrot.slane %v2700_v56, %v3493_v5 }
 0x31f   :  { %2334 = vmatprep.subr.bf16.mxu0 %v3233_v58  ;;  %v2383_v58 = vrot.slane %v2700_v56, %v3498_v8 }
 0x322   :  { %2335 = vmatpush1.bf16.msra.mxu0 %v3231_v59 }
 0x323   :  { %2336 = vmatprep.subr.bf16.mxu0 %v3236_v60 }
 0x326   :  { %2337 = vmatpush1.bf16.msra.mxu0 %v3234_v62 }
 0x327   :  { %2338 = vmatprep.subr.bf16.mxu0 %v3239_v55 }
 0x32a   :  { %2339 = vmatpush1.bf16.msra.mxu0 %v3237_v26 }
 0x32b   :  { %2340 = vmatprep.subr.bf16.mxu0 %v3242_v27 }
 0x32e   :  { %2341 = vmatpush1.bf16.msra.mxu0 %v3240_v1 }
 0x32f   :  { %2342 = vmatprep.subr.bf16.mxu0 %v3245_v2 }
 0x332   :  { %2343 = vmatpush1.bf16.msra.mxu0 %v3243_v3 }
 0x333   :  { %2344 = vmatprep.subr.bf16.mxu0 %v3248_v7 }
 0x336   :  { %2345 = vmatpush1.bf16.msra.mxu0 %v3246_v9 }
 0x339   :  { %2347 = vmatmul.mubr.bf16.vlgmr.msra.gmra.mrb[8].mxu0 %v3613_v36  ;;  %v2453_v36 = vld [vmem:[#allocation7 + $0xa0] sm:$0xff] }
 0x33a   :  { %2356 = vmatprep.mubr.bf16.mxu0 %v3620_v4  ;;  %v2454_v4 = vld [vmem:[#allocation7 + $0xa8] sm:$0xff] }
 0x33b   :  { %v2861_v63 = vpack.c.bf16 %v2454_v4, %v2453_v36 }
 0x33d   :  { %2862 = vmatprep.subr.bf16.mxu1 %v2861_v63 }
 0x341   :  { %2357 = vmatmul.mubr.bf16.gmra.mrb[12].mxu0 %v3623_v6  ;;  %v2437_v6 = vld [vmem:[#allocation7 + $0x20] sm:$0xff] }
 0x342   :  { %v2863_v25 = vpack.c.bf16 %v2438_v21, %v2437_v6 }
 0x344   :  { %2864 = vmatpush3.bf16.msra.mxu1 %v2863_v25 }
 0x345   :  { %2866 = vmatprep.subr.bf16.mxu1 %v2865_v11 }
 0x348   :  { %2868 = vmatpush3.bf16.msra.mxu1 %v2867_v33 }
 0x349   :  { %2870 = vmatprep.subr.bf16.mxu1 %v2869_v23 }
 0x34c   :  { %2872 = vmatpush3.bf16.msra.mxu1 %v2871_v0 }
 0x34d   :  { %2874 = vmatprep.subr.bf16.mxu1 %v2873_v41 }
 0x350   :  { %2876 = vmatpush3.bf16.msra.mxu1 %v2875_v45 }
 0x351   :  { %2878 = vmatprep.subr.bf16.mxu1 %v2877_v47 }
 0x354   :  { %2880 = vmatpush3.bf16.msra.mxu1 %v2879_v48 }
 0x355   :  { %2882 = vmatprep.subr.bf16.mxu1 %v2881_v52  ;;  %v2809_v52 = vld [vmem:[%s3662_s5] ss:$0 sm:$0xff] }
 0x358   :  { %2884 = vmatpush3.bf16.msra.mxu1 %v2883_v54 }
 0x40c   :  { %v2348_v59 = vpop.f32.mrb[8].mxu0 }
 0x40d   :  { %v2386_v60 = vadd.f32 %v2379_v57, %v2348_v59  ;;  %v2350_v62 = vpop.f32.mrb[9].mxu0 }
 0x40e   :  { %v2387_v55 = vadd.f32 %v2383_v58, %v2350_v62  ;;  %v2352_v26 = vpop.f32.mrb[10].mxu0 }
 0x40f   :  { %v2388_v27 = vadd.f32 %v2379_v57, %v2352_v26  ;;  %v2354_v1 = vpop.f32.mrb[11].mxu0  ;;  %v2394_v3 = vmax.f32 %v2386_v60, 0.0 }
 0x410   :  { %v2389_v2 = vadd.f32 %v2383_v58, %v2354_v1  ;;  %v2395_v9 = vmax.f32 %v2387_v55, 0.0 }
 0x411   :  { %v2396_v7 = vmax.f32 %v2388_v27, 0.0 }
 0x412   :  { %v2397_v12 = vmax.f32 %v2389_v2, 0.0 }
 0x413   :  { %v2402_v13 = vadd.f32 %v2396_v7, %v2394_v3 }
 0x414   :  { %v2409_v14 = vadd.f32 %v2397_v12, %v2395_v9  ;;  %v2358_v15 = vpop.f32.mrb[12].mxu0 }
 0x415   :  { %v2403_v16 = vrot.slane %v2402_v13, 4  ;;  %v2390_v17 = vadd.f32 %v2379_v57, %v2358_v15  ;;  %v2360_v5 = vpop.f32.mrb[13].mxu0 }
 0x416   :  { %v2410_v18 = vrot.slane %v2409_v14, 4  ;;  %v2391_v8 = vadd.f32 %v2383_v58, %v2360_v5  ;;  %v2362_v19 = vpop.f32.mrb[14].mxu0 }
 0x417   :  { %v2404_v20 = vadd.f32 %v2403_v16, %v2402_v13  ;;  %v2392_v22 = vadd.f32 %v2379_v57, %v2362_v19  ;;  %v2364_v24 = vpop.f32.mrb[15].mxu0  ;;  %v2398_v4 = vmax.f32 %v2390_v17, 0.0 }
 0x418   :  { %v2411_v49 = vadd.f32 %v2410_v18, %v2409_v14  ;;  %v2393_v36 = vadd.f32 %v2383_v58, %v2364_v24  ;;  %v2399_v6 = vmax.f32 %v2391_v8, 0.0 }
 0x419   :  { %v2400_v63 = vmax.f32 %v2392_v22, 0.0  ;;  %v2405_v25 = vrot.slane %v2404_v20, 2 }
 0x41a   :  { %v2401_v21 = vmax.f32 %v2393_v36, 0.0  ;;  %v2412_v31 = vrot.slane %v2411_v49, 2 }
 0x41b   :  { %v2416_v30 = vadd.f32 %v2400_v63, %v2398_v4  ;;  %v2406_v33 = vadd.f32 %v2405_v25, %v2404_v20 }
 0x41c   :  { %v2423_v11 = vadd.f32 %v2401_v21, %v2399_v6  ;;  %v2413_v35 = vadd.f32 %v2412_v31, %v2411_v49 }
 0x41d   :  { %v2417_v38 = vrot.slane %v2416_v30, 4  ;;  %v2407_v0 = vrot.slane %v2406_v33, 1 }
 0x41e   :  { %v2424_v32 = vrot.slane %v2423_v11, 4  ;;  %v2414_v41 = vrot.slane %v2413_v35, 1 }
 0x41f   :  { %v2418_v34 = vadd.f32 %v2417_v38, %v2416_v30  ;;  %v2408_v45 = vadd.f32 %v2407_v0, %v2406_v33 }
 0x420   :  { %v2425_v23 = vadd.f32 %v2424_v32, %v2423_v11  ;;  %v2415_v46 = vadd.f32 %v2414_v41, %v2413_v35 }
 0x421   :  { %v2419_v43 = vrot.slane %v2418_v34, 2 }
 0x422   :  { %v2426_v39 = vrot.slane %v2425_v23, 2 }
 0x423   :  { %v2420_v37 = vadd.f32 %v2419_v43, %v2418_v34 }
 0x424   :  { %v2427_v40 = vadd.f32 %v2426_v39, %v2425_v23 }
 0x425   :  { %v2421_v42 = vrot.slane %v2420_v37, 1 }
 0x426   :  { %v2428_v44 = vrot.slane %v2427_v40, 1 }
 0x427   :  { %v2422_v10 = vadd.f32 %v2421_v42, %v2420_v37 }
 0x428   :  { %v2429_v47 = vadd.f32 %v2428_v44, %v2427_v40 }
 0x429   :  { %v2431_v61 = vsel %vm70_vm12, %v2408_v45, %v2422_v10 }
 0x42a   :  { %v2432_v28 = vsel %vm70_vm12, %v2415_v46, %v2429_v47 }
 0x42b   :  { %2529 = vmatprep.mubr.f32.mxu1 %v2432_v28 }
 0x42c   :  { %2530 = vmatmul.mubr.f32.vlgmr.msra.gmra.mrb[16].mxu1 %v2431_v61 }
 0x4ff   :  { %v2850_v48 = vpop.f32.mrb[16].mxu1 }
 0x500   :  { %v2851_v50 = vpop.f32.mrb[17].mxu1 }
 0x501   :  { %v2852_v51 = vadd.f32 %v2851_v50, %v2850_v48 }
 0x503   :  { %v2535_v29 = vmul.f32 0.00390625, %v2852_v51 }
 0x505   :  { %v2543_v53 = vadd.f32 %v2809_v52, %v2535_v29 }
 0x507   :  { %2544 = vst [vmem:[#allocation9] sm:$0x3] %v2543_v53 }
 0x508   :  { %3304 = shalt.err (!%p3301_p6)
}
 0x509   :  { %s3305_s25 = scalar_lea.hbm %s3663_s6, 32 }
 0x50a   :  { %p3306_p7 = scmp.ne.s32.totalorder %s3663_s6, %s3305_s25  ;;  %p3309_p8 = scmp.lt.u32.totalorder %s3305_s25, %s3663_s6 }
 0x50c   :  { %p3311_p9 = pnand %p3309_p8, %p3306_p7 }
 0x50e   :  { %3314 = shalt.err (!%p3311_p9)
}
 0x50f   :  { %2554 = dma.vmem_to_hbm [thread:$0]  %s2552_s22, 32, %s3663_s6, [#allocation6]  }
 0x510   :  { %3319 = dma.done.wait [#allocation6], 32  }
 0x511   :  { %3320 = vsyncadd [#allocation6], 4294967264 }
 0x512   :  { %2558 = vsyncpa [#allocation5], 1 }
 0x513   :  { %2559 = vsyncpa [#allocation8], 1 }
 0x514   :  { %2560 = vsyncpa [#allocation6], 1 }

</bundles_post_ra>
